<compile_context>
chip_gen: v5e
topology: v5e:2x2
jax: 0.10.0
libtpu: 0.0.40
codegen_flags: <defaults>
</compile_context>

<pallas_src>
from collections import defaultdict, deque

import numpy as np
import jax
import jax.numpy as jnp
from jax import lax
from jax.experimental import pallas as pl
from jax.experimental.pallas import tpu as pltpu

HIDDEN = 32   # hidden_size
VOCAB = 20    # vocab.size()


# ----------------------------------------------------------------------------- kernel
def fused_encoder_kernel(starts_ref,                                   # SMEM [L+1] int32
                         onehot_ref, emb_ref, ssrc_ref, sdst_ref, P_ref, G_ref,
                         wz_x_ref, bz_ref, wz_s_ref,
                         wh_x_ref, bh_ref, wh_r_ref,
                         wr_ref, bur_ref, ur_ref,
                         w_x_ref, w_m_ref, b_out_ref,
                         h_ref):
    H = HIDDEN
    E = P_ref.shape[0]
    num_levels = starts_ref.shape[0] - 1        # static Python int
    f32 = jnp.float32
    bf16 = jnp.bfloat16

    # ---- one-time setup: embedding + apply_edges(src_x/dst_x) + loop-invariant gate linears
    x = jnp.dot(onehot_ref[...], emb_ref[...], preferred_element_type=f32)       # [N,H]
    x_b = x.astype(bf16)
    src_x = jnp.dot(ssrc_ref[...], x_b, preferred_element_type=f32)              # [E,H]
    dst_x = jnp.dot(sdst_ref[...], x_b, preferred_element_type=f32)              # [E,H]
    zx = jnp.dot(src_x, wz_x_ref[...], preferred_element_type=f32) + bz_ref[...]
    hx = jnp.dot(src_x, wh_x_ref[...], preferred_element_type=f32) + bh_ref[...]
    rd = jnp.dot(dst_x, wr_ref[...], preferred_element_type=f32) + bur_ref[...]

    # Hoist loop-invariant weight loads out of the unrolled loop.
    P = P_ref[...]                              # bf16 [E,E] line-graph (backtracking=False)
    wz_s = wz_s_ref[...]
    wh_r = wh_r_ref[...]
    ur = ur_ref[...]
    eidx = lax.broadcasted_iota(jnp.int32, (E, 1), 0)

    # ---- per-level GRU message passing (pull on the level's contiguous eid range)
    def level_body(lvl, carry):
        m, rm = carry
        start = starts_ref[lvl]
        stop = starts_ref[lvl + 1]
        active = (eidx >= start) & (eidx < stop)                      # [E,1] iota mask

        s = jnp.dot(P, m.astype(bf16), preferred_element_type=f32)    # enc_tree_msg1/reduce1
        arm = jnp.dot(P, rm.astype(bf16), preferred_element_type=f32) # enc_tree_msg2/reduce2
        z = jax.nn.sigmoid(zx + jnp.dot(s, wz_s, preferred_element_type=f32))
        m_tilde = jnp.tanh(hx + jnp.dot(arm, wh_r, preferred_element_type=f32))
        m_new = (1.0 - z) * s + z * m_tilde
        r = jax.nn.sigmoid(rd + jnp.dot(m_new, ur, preferred_element_type=f32))
        rm_new = r * m_new

        # DGL pull() only writes the level's edges.
        m = jnp.where(active, m_new, m)
        rm = jnp.where(active, rm_new, rm)
        return m, rm

    m0 = jnp.zeros((E, H), f32)
    rm0 = jnp.zeros((E, H), f32)
    m_final, _ = lax.fori_loop(0, num_levels, level_body, (m0, rm0), unroll=True)

    # ---- update_all(copy_edge, sum) + EncoderGatherUpdate:  h = relu(W_x x + W_m m + b)
    m_node = jnp.dot(G_ref[...], m_final.astype(bf16), preferred_element_type=f32)
    pre = (jnp.dot(x, w_x_ref[...], preferred_element_type=f32)
           + jnp.dot(m_node, w_m_ref[...], preferred_element_type=f32)
           + b_out_ref[...])
    h_ref[...] = jnp.maximum(pre, 0.0)


# ----------------------------------------------------------------------------- params
def init_params(key, vocab_size, hidden):
    """Deterministic synthetic weights, shapes as in the PyTorch module __init__."""
    def linear(k, fan_in, shape):
        bound = 1.0 / np.sqrt(fan_in)
        return jax.random.uniform(k, shape, jnp.float32, -bound, bound)

    ks = jax.random.split(key, 13)
    H = hidden
    return {
        'emb':  jax.random.normal(ks[0], (vocab_size, H), jnp.float32) * 0.1,
        # GRUUpdate: W_z Linear(2H,H), W_r Linear(H,H,no bias), U_r Linear(H,H), W_h Linear(2H,H)
        'wz_x': linear(ks[1], 2 * H, (H, H)), 'wz_s': linear(ks[2], 2 * H, (H, H)),
        'bz':   linear(ks[3], 2 * H, (1, H)),
        'wr':   linear(ks[4], H, (H, H)),
        'ur':   linear(ks[5], H, (H, H)), 'bur': linear(ks[6], H, (1, H)),
        'wh_x': linear(ks[7], 2 * H, (H, H)), 'wh_r': linear(ks[8], 2 * H, (H, H)),
        'bh':   linear(ks[9], 2 * H, (1, H)),
        # EncoderGatherUpdate: W Linear(2H,H)
        'w_x':  linear(ks[10], 2 * H, (H, H)), 'w_m': linear(ks[11], 2 * H, (H, H)),
        'b':    linear(ks[12], 2 * H, (1, H)),
    }


# ----------------------------------------------------------------------------- graph glue
def build_batched_tree():
    """Small batched forest (2 junction trees), bidirected edges, BFS level order.

    Edges are renumbered so each BFS level occupies a contiguous eid range
    [level_starts[l], level_starts[l+1]); the kernel rebuilds the per-level mask from
    two iota compares instead of loading a dense [L,E,1] mask stack.
    """
    bonds = [(0, 1), (0, 2), (1, 3), (1, 4), (5, 6), (6, 7), (6, 8)]
    n_nodes = 9
    roots = [0, 5]                       # node_offset[:-1]
    adj = defaultdict(list)
    for u, v in bonds:
        adj[u].append(v)
        adj[v].append(u)
    depth, parent = {}, {}
    for r in roots:
        depth[r] = 0
        parent[r] = -1
        q = deque([r])
        while q:
            u = q.popleft()
            for w in adj[u]:
                if w not in depth:
                    depth[w] = depth[u] + 1
                    parent[w] = u
                    q.append(w)

    # level_order(): reversed bottom-up (child->parent) levels, then top-down levels
    max_d = max(depth.values())
    fwd_levels, bwd_levels = [], []
    for d in range(1, max_d + 1):
        nodes_d = [v for v in range(n_nodes) if depth[v] == d]
        fwd_levels.append([(parent[v], v) for v in nodes_d])
        bwd_levels.append([(v, parent[v]) for v in nodes_d])
    level_order = list(reversed(bwd_levels)) + fwd_levels

    # Renumber edges level-contiguously (every directed tree edge appears in exactly one level).
    edges = [e for lvl in level_order for e in lvl]
    level_starts = np.zeros(len(level_order) + 1, np.int32)
    for li, lvl in enumerate(level_order):
        level_starts[li + 1] = level_starts[li] + len(lvl)

    E_pad, N_pad = 16, 16

    # src/dst one-hot incidence (apply_edges gathers done in-kernel via matmul)
    Ssrc = np.zeros((E_pad, N_pad), np.float32)
    Sdst = np.zeros((E_pad, N_pad), np.float32)
    for i, (u, v) in enumerate(edges):
        Ssrc[i, u] = 1.0
        Sdst[i, v] = 1.0

    # dgl.line_graph(backtracking=False): e'(w->u) is predecessor of e(u->v) iff w != v
    P = np.zeros((E_pad, E_pad), np.float32)
    for i, (u, v) in enumerate(edges):
        for j, (w, x) in enumerate(edges):
            if x == u and w != v:
                P[i, j] = 1.0

    # node incidence for the final update_all: G[v, e] = 1 iff dst(e) == v
    G = np.zeros((N_pad, E_pad), np.float32)
    for i, (u, v) in enumerate(edges):
        G[v, i] = 1.0

    rng = np.random.RandomState(0)
    wid = rng.randint(0, VOCAB, size=n_nodes).astype(np.int32)
    onehot = np.zeros((N_pad, VOCAB), np.float32)
    onehot[np.arange(n_nodes), wid] = 1.0     # padded node rows stay exactly zero

    return dict(n_nodes=n_nodes, roots=np.array(roots, np.int32),
                Ssrc=Ssrc, Sdst=Sdst, P=P, G=G,
                level_starts=level_starts, onehot=onehot, wid=wid,
                N_pad=N_pad, E_pad=E_pad)


# ----------------------------------------------------------------------------- forward
def dgl_jtnn_encoder_forward(params, g):
    H = HIDDEN
    N, E, V = g['N_pad'], g['E_pad'], VOCAB
    level_starts = jnp.asarray(g['level_starts'], jnp.int32)
    L = int(g['level_starts'].shape[0]) - 1
    bf16 = jnp.bfloat16

    # 0/1 incidence operands in bf16 (exact), learned weights in f32.
    tensor_inputs = (
        jnp.asarray(g['onehot'], bf16), params['emb'].astype(bf16),
        jnp.asarray(g['Ssrc'], bf16), jnp.asarray(g['Sdst'], bf16),
        jnp.asarray(g['P'], bf16), jnp.asarray(g['G'], bf16),
        params['wz_x'], params['bz'], params['wz_s'],
        params['wh_x'], params['bh'], params['wh_r'],
        params['wr'], params['bur'], params['ur'],
        params['w_x'], params['w_m'], params['b'],
    )

    def _const_spec(arr):   # loop-invariant, full-array block (single grid step)
        nd = arr.ndim
        return pl.BlockSpec(arr.shape, lambda i, starts, _nd=nd: (0,) * _nd)

    in_specs = [_const_spec(a) for a in tensor_inputs]

    flops = int(
        2 * (N * V * H + 2 * E * N * H + 3 * E * H * H)          # setup matmuls
        + L * 2 * (2 * E * E * H + 3 * E * H * H)                # per-level matmuls
        + 2 * (N * E * H + 2 * N * H * H))                       # finalize
    transcendentals = int(L * 3 * E * H)
    bytes_accessed = int(sum(int(np.prod(a.shape)) * a.dtype.itemsize for a in tensor_inputs)
                         + 4 * (L + 1) + 4 * N * H)

    h = pl.pallas_call(
        fused_encoder_kernel,
        grid_spec=pltpu.PrefetchScalarGridSpec(
            num_scalar_prefetch=1,            # level_starts -> SMEM
            grid=(1,),                        # single invocation; levels loop in-kernel
            in_specs=in_specs,
            out_specs=pl.BlockSpec((N, H), lambda i, starts: (0, 0)),
            scratch_shapes=[]),
        out_shape=jax.ShapeDtypeStruct((N, H), jnp.float32),
        compiler_params=pltpu.CompilerParams(
            dimension_semantics=("arbitrary",),
            # Explicit scoped-VMEM budget (v5e defaults to only 16 MiB); tiny here,
            # must be re-derived when E scales.
            vmem_limit_bytes=32 * 1024 * 1024),
        cost_estimate=pl.CostEstimate(flops=flops, transcendentals=transcendentals,
                                      bytes_accessed=bytes_accessed),
    )(level_starts, *tensor_inputs)

    root_vecs = h[jnp.asarray(g['roots'])]
    return h, root_vecs


# pure-JAX f32 reference of the same math (validates bf16 incidence + iota masking)
def reference_forward(params, g):
    H = HIDDEN
    x = jnp.asarray(g['onehot']) @ params['emb']
    src_x = jnp.asarray(g['Ssrc']) @ x
    dst_x = jnp.asarray(g['Sdst']) @ x
    E = g['E_pad']
    m = jnp.zeros((E, H), jnp.float32)
    rm = jnp.zeros((E, H), jnp.float32)
    P = jnp.asarray(g['P'])
    starts = g['level_starts']
    for li in range(len(starts) - 1):
        mask_np = np.zeros((E, 1), np.float32)
        mask_np[starts[li]:starts[li + 1]] = 1.0
        mask = jnp.asarray(mask_np)
        s = P @ m
        arm = P @ rm
        z = jax.nn.sigmoid(src_x @ params['wz_x'] + s @ params['wz_s'] + params['bz'])
        mt = jnp.tanh(src_x @ params['wh_x'] + arm @ params['wh_r'] + params['bh'])
        m_new = (1.0 - z) * s + z * mt
        r = jax.nn.sigmoid(dst_x @ params['wr'] + m_new @ params['ur'] + params['bur'])
        rm_new = r * m_new
        m = mask * m_new + (1.0 - mask) * m
        rm = mask * rm_new + (1.0 - mask) * rm
    m_node = jnp.asarray(g['G']) @ m
    h = jax.nn.relu(x @ params['w_x'] + m_node @ params['w_m'] + params['b'])
    return h, h[np.asarray(g['roots'])]


# TODO(synk): host-side BFS/level_order scheduling and dynamic per-molecule graph
# construction have no Pallas equivalent; they are precomputed as dense bf16 incidence
# matrices + level-contiguous edge ranges. At realistic batched-forest sizes: (a) replace
# the dense [E,E] line-graph matrix with scalar-prefetched predecessor index lists or a
# tiled/emit_pipeline contraction (v7x has only 64 MiB VMEM), (b) add a "parallel" grid
# axis over independent trees for v7x's 2 TensorCores, and (c) move the edge state to an
# E-major (lane-dense) layout once E >= 128.

if __name__ == "__main__":
    key = jax.random.PRNGKey(0)
    params = init_params(key, VOCAB, HIDDEN)
    graph = build_batched_tree()

    h, root_vecs = dgl_jtnn_encoder_forward(params, graph)
    jax.block_until_ready(root_vecs)

    h_ref, root_ref = reference_forward(params, graph)
    assert root_vecs.shape == (2, HIDDEN)
    assert bool(jnp.all(jnp.isfinite(root_vecs)))
    # bf16 incidence matmuls introduce <~0.5% relative error vs the f32 reference.
    assert np.allclose(np.asarray(h), np.asarray(h_ref), rtol=2e-2, atol=2e-2)
    assert np.allclose(np.asarray(root_vecs), np.asarray(root_ref), rtol=2e-2, atol=2e-2)

    print("KERNEL_OK")
</pallas_src>

<mosaic_0001>
module attributes {stable_mosaic.version = 11 : i64} {
  func.func @fused_encoder_kernel(%arg0: i32, %arg1: memref<5xi32, #tpu.memory_space<smem>>, %arg2: memref<16x20xbf16, #tpu.memory_space<vmem>>, %arg3: memref<20x32xbf16, #tpu.memory_space<vmem>>, %arg4: memref<16x16xbf16, #tpu.memory_space<vmem>>, %arg5: memref<16x16xbf16, #tpu.memory_space<vmem>>, %arg6: memref<16x16xbf16, #tpu.memory_space<vmem>>, %arg7: memref<16x16xbf16, #tpu.memory_space<vmem>>, %arg8: memref<32x32xf32, #tpu.memory_space<vmem>>, %arg9: memref<1x32xf32, #tpu.memory_space<vmem>>, %arg10: memref<32x32xf32, #tpu.memory_space<vmem>>, %arg11: memref<32x32xf32, #tpu.memory_space<vmem>>, %arg12: memref<1x32xf32, #tpu.memory_space<vmem>>, %arg13: memref<32x32xf32, #tpu.memory_space<vmem>>, %arg14: memref<32x32xf32, #tpu.memory_space<vmem>>, %arg15: memref<1x32xf32, #tpu.memory_space<vmem>>, %arg16: memref<32x32xf32, #tpu.memory_space<vmem>>, %arg17: memref<32x32xf32, #tpu.memory_space<vmem>>, %arg18: memref<32x32xf32, #tpu.memory_space<vmem>>, %arg19: memref<1x32xf32, #tpu.memory_space<vmem>>, %arg20: memref<16x32xf32, #tpu.memory_space<vmem>>) attributes {dimension_semantics = [#tpu.dimension_semantics<arbitrary>], iteration_bounds = array<i64: 1>, scalar_prefetch = 1 : i64, scratch_operands = 0 : i64, tpu.core_type = #tpu.core_type<tc>, window_params = [{pipeline_mode = #tpu.pipeline_mode<synchronous>, transform_indices = @transform_0, window_bounds = array<i64: 16, 20>}, {pipeline_mode = #tpu.pipeline_mode<synchronous>, transform_indices = @transform_1, window_bounds = array<i64: 20, 32>}, {pipeline_mode = #tpu.pipeline_mode<synchronous>, transform_indices = @transform_2, window_bounds = array<i64: 16, 16>}, {pipeline_mode = #tpu.pipeline_mode<synchronous>, transform_indices = @transform_3, window_bounds = array<i64: 16, 16>}, {pipeline_mode = #tpu.pipeline_mode<synchronous>, transform_indices = @transform_4, window_bounds = array<i64: 16, 16>}, {pipeline_mode = #tpu.pipeline_mode<synchronous>, transform_indices = @transform_5, window_bounds = array<i64: 16, 16>}, {pipeline_mode = #tpu.pipeline_mode<synchronous>, transform_indices = @transform_6, window_bounds = array<i64: 32, 32>}, {pipeline_mode = #tpu.pipeline_mode<synchronous>, transform_indices = @transform_7, window_bounds = array<i64: 1, 32>}, {pipeline_mode = #tpu.pipeline_mode<synchronous>, transform_indices = @transform_8, window_bounds = array<i64: 32, 32>}, {pipeline_mode = #tpu.pipeline_mode<synchronous>, transform_indices = @transform_9, window_bounds = array<i64: 32, 32>}, {pipeline_mode = #tpu.pipeline_mode<synchronous>, transform_indices = @transform_10, window_bounds = array<i64: 1, 32>}, {pipeline_mode = #tpu.pipeline_mode<synchronous>, transform_indices = @transform_11, window_bounds = array<i64: 32, 32>}, {pipeline_mode = #tpu.pipeline_mode<synchronous>, transform_indices = @transform_12, window_bounds = array<i64: 32, 32>}, {pipeline_mode = #tpu.pipeline_mode<synchronous>, transform_indices = @transform_13, window_bounds = array<i64: 1, 32>}, {pipeline_mode = #tpu.pipeline_mode<synchronous>, transform_indices = @transform_14, window_bounds = array<i64: 32, 32>}, {pipeline_mode = #tpu.pipeline_mode<synchronous>, transform_indices = @transform_15, window_bounds = array<i64: 32, 32>}, {pipeline_mode = #tpu.pipeline_mode<synchronous>, transform_indices = @transform_16, window_bounds = array<i64: 32, 32>}, {pipeline_mode = #tpu.pipeline_mode<synchronous>, transform_indices = @transform_17, window_bounds = array<i64: 1, 32>}, {pipeline_mode = #tpu.pipeline_mode<synchronous>, transform_indices = @transform_18, window_bounds = array<i64: 16, 32>}]} {
    %c0 = arith.constant 0 : index
    %c0_0 = arith.constant 0 : index
    %0 = vector.load %arg2[%c0, %c0_0] : memref<16x20xbf16, #tpu.memory_space<vmem>>, vector<16x20xbf16>
    %c0_1 = arith.constant 0 : index
    %c0_2 = arith.constant 0 : index
    %1 = vector.load %arg3[%c0_1, %c0_2] : memref<20x32xbf16, #tpu.memory_space<vmem>>, vector<20x32xbf16>
    %cst = arith.constant dense<0.000000e+00> : vector<16x32xf32>
    %2 = tpu.matmul %0, %1, %cst {dimension_numbers = #tpu.dot_dimension_numbers<[1], [0], [0], [1], [0, 0, 1, 1], [], []>} : vector<16x20xbf16>, vector<20x32xbf16>, vector<16x32xf32> -> vector<16x32xf32>
    %3 = arith.truncf %2 : vector<16x32xf32> to vector<16x32xbf16>
    %c0_3 = arith.constant 0 : index
    %c0_4 = arith.constant 0 : index
    %4 = vector.load %arg4[%c0_3, %c0_4] : memref<16x16xbf16, #tpu.memory_space<vmem>>, vector<16x16xbf16>
    %cst_5 = arith.constant dense<0.000000e+00> : vector<16x32xf32>
    %5 = tpu.matmul %4, %3, %cst_5 {dimension_numbers = #tpu.dot_dimension_numbers<[1], [0], [0], [1], [0, 0, 1, 1], [], []>} : vector<16x16xbf16>, vector<16x32xbf16>, vector<16x32xf32> -> vector<16x32xf32>
    %c0_6 = arith.constant 0 : index
    %c0_7 = arith.constant 0 : index
    %6 = vector.load %arg5[%c0_6, %c0_7] : memref<16x16xbf16, #tpu.memory_space<vmem>>, vector<16x16xbf16>
    %cst_8 = arith.constant dense<0.000000e+00> : vector<16x32xf32>
    %7 = tpu.matmul %6, %3, %cst_8 {dimension_numbers = #tpu.dot_dimension_numbers<[1], [0], [0], [1], [0, 0, 1, 1], [], []>} : vector<16x16xbf16>, vector<16x32xbf16>, vector<16x32xf32> -> vector<16x32xf32>
    %c0_9 = arith.constant 0 : index
    %c0_10 = arith.constant 0 : index
    %8 = vector.load %arg8[%c0_9, %c0_10] : memref<32x32xf32, #tpu.memory_space<vmem>>, vector<32x32xf32>
    %cst_11 = arith.constant dense<0.000000e+00> : vector<16x32xf32>
    %9 = tpu.matmul %5, %8, %cst_11 {dimension_numbers = #tpu.dot_dimension_numbers<[1], [0], [0], [1], [0, 0, 1, 1], [], []>} : vector<16x32xf32>, vector<32x32xf32>, vector<16x32xf32> -> vector<16x32xf32>
    %c0_12 = arith.constant 0 : index
    %c0_13 = arith.constant 0 : index
    %10 = vector.load %arg9[%c0_12, %c0_13] : memref<1x32xf32, #tpu.memory_space<vmem>>, vector<1x32xf32>
    %11 = vector.broadcast %10 : vector<1x32xf32> to vector<16x32xf32>
    %12 = arith.addf %9, %11 : vector<16x32xf32>
    %c0_14 = arith.constant 0 : index
    %c0_15 = arith.constant 0 : index
    %13 = vector.load %arg11[%c0_14, %c0_15] : memref<32x32xf32, #tpu.memory_space<vmem>>, vector<32x32xf32>
    %cst_16 = arith.constant dense<0.000000e+00> : vector<16x32xf32>
    %14 = tpu.matmul %5, %13, %cst_16 {dimension_numbers = #tpu.dot_dimension_numbers<[1], [0], [0], [1], [0, 0, 1, 1], [], []>} : vector<16x32xf32>, vector<32x32xf32>, vector<16x32xf32> -> vector<16x32xf32>
    %c0_17 = arith.constant 0 : index
    %c0_18 = arith.constant 0 : index
    %15 = vector.load %arg12[%c0_17, %c0_18] : memref<1x32xf32, #tpu.memory_space<vmem>>, vector<1x32xf32>
    %16 = vector.broadcast %15 : vector<1x32xf32> to vector<16x32xf32>
    %17 = arith.addf %14, %16 : vector<16x32xf32>
    %c0_19 = arith.constant 0 : index
    %c0_20 = arith.constant 0 : index
    %18 = vector.load %arg14[%c0_19, %c0_20] : memref<32x32xf32, #tpu.memory_space<vmem>>, vector<32x32xf32>
    %cst_21 = arith.constant dense<0.000000e+00> : vector<16x32xf32>
    %19 = tpu.matmul %7, %18, %cst_21 {dimension_numbers = #tpu.dot_dimension_numbers<[1], [0], [0], [1], [0, 0, 1, 1], [], []>} : vector<16x32xf32>, vector<32x32xf32>, vector<16x32xf32> -> vector<16x32xf32>
    %c0_22 = arith.constant 0 : index
    %c0_23 = arith.constant 0 : index
    %20 = vector.load %arg15[%c0_22, %c0_23] : memref<1x32xf32, #tpu.memory_space<vmem>>, vector<1x32xf32>
    %21 = vector.broadcast %20 : vector<1x32xf32> to vector<16x32xf32>
    %22 = arith.addf %19, %21 : vector<16x32xf32>
    %c0_24 = arith.constant 0 : index
    %c0_25 = arith.constant 0 : index
    %23 = vector.load %arg6[%c0_24, %c0_25] : memref<16x16xbf16, #tpu.memory_space<vmem>>, vector<16x16xbf16>
    %c0_26 = arith.constant 0 : index
    %c0_27 = arith.constant 0 : index
    %24 = vector.load %arg10[%c0_26, %c0_27] : memref<32x32xf32, #tpu.memory_space<vmem>>, vector<32x32xf32>
    %c0_28 = arith.constant 0 : index
    %c0_29 = arith.constant 0 : index
    %25 = vector.load %arg13[%c0_28, %c0_29] : memref<32x32xf32, #tpu.memory_space<vmem>>, vector<32x32xf32>
    %c0_30 = arith.constant 0 : index
    %c0_31 = arith.constant 0 : index
    %26 = vector.load %arg16[%c0_30, %c0_31] : memref<32x32xf32, #tpu.memory_space<vmem>>, vector<32x32xf32>
    %27 = tpu.iota {dimensions = array<i32: 0>} : vector<16x1xi32>
    %cst_32 = arith.constant 0.000000e+00 : f32
    %28 = vector.broadcast %cst_32 : f32 to vector<16x32xf32>
    %cst_33 = arith.constant 0.000000e+00 : f32
    %29 = vector.broadcast %cst_33 : f32 to vector<16x32xf32>
    %c0_i32 = arith.constant 0 : i32
    %30 = arith.index_cast %c0_i32 : i32 to index
    %31 = memref.load %arg1[%30] : memref<5xi32, #tpu.memory_space<smem>>
    %c1_i32 = arith.constant 1 : i32
    %32 = arith.addi %c0_i32, %c1_i32 : i32
    %33 = arith.index_cast %32 : i32 to index
    %34 = memref.load %arg1[%33] : memref<5xi32, #tpu.memory_space<smem>>
    %35 = vector.broadcast %31 : i32 to vector<16x1xi32>
    %36 = arith.cmpi sge, %27, %35 : vector<16x1xi32>
    %37 = vector.broadcast %34 : i32 to vector<16x1xi32>
    %38 = arith.cmpi slt, %27, %37 : vector<16x1xi32>
    %39 = arith.andi %36, %38 : vector<16x1xi1>
    %40 = arith.truncf %28 : vector<16x32xf32> to vector<16x32xbf16>
    %cst_34 = arith.constant dense<0.000000e+00> : vector<16x32xf32>
    %41 = tpu.matmul %23, %40, %cst_34 {dimension_numbers = #tpu.dot_dimension_numbers<[1], [0], [0], [1], [0, 0, 1, 1], [], []>} : vector<16x16xbf16>, vector<16x32xbf16>, vector<16x32xf32> -> vector<16x32xf32>
    %42 = arith.truncf %29 : vector<16x32xf32> to vector<16x32xbf16>
    %cst_35 = arith.constant dense<0.000000e+00> : vector<16x32xf32>
    %43 = tpu.matmul %23, %42, %cst_35 {dimension_numbers = #tpu.dot_dimension_numbers<[1], [0], [0], [1], [0, 0, 1, 1], [], []>} : vector<16x16xbf16>, vector<16x32xbf16>, vector<16x32xf32> -> vector<16x32xf32>
    %cst_36 = arith.constant dense<0.000000e+00> : vector<16x32xf32>
    %44 = tpu.matmul %41, %24, %cst_36 {dimension_numbers = #tpu.dot_dimension_numbers<[1], [0], [0], [1], [0, 0, 1, 1], [], []>} : vector<16x32xf32>, vector<32x32xf32>, vector<16x32xf32> -> vector<16x32xf32>
    %45 = arith.addf %12, %44 : vector<16x32xf32>
    %46 = arith.negf %45 : vector<16x32xf32>
    %47 = math.exp %46 : vector<16x32xf32>
    %cst_37 = arith.constant 1.000000e+00 : f32
    %48 = vector.broadcast %cst_37 : f32 to vector<16x32xf32>
    %49 = arith.addf %48, %47 : vector<16x32xf32>
    %50 = arith.divf %48, %49 : vector<16x32xf32>
    %cst_38 = arith.constant dense<0.000000e+00> : vector<16x32xf32>
    %51 = tpu.matmul %43, %25, %cst_38 {dimension_numbers = #tpu.dot_dimension_numbers<[1], [0], [0], [1], [0, 0, 1, 1], [], []>} : vector<16x32xf32>, vector<32x32xf32>, vector<16x32xf32> -> vector<16x32xf32>
    %52 = arith.addf %17, %51 : vector<16x32xf32>
    %53 = math.tanh %52 : vector<16x32xf32>
    %cst_39 = arith.constant 1.000000e+00 : f32
    %54 = vector.broadcast %cst_39 : f32 to vector<16x32xf32>
    %55 = arith.subf %54, %50 : vector<16x32xf32>
    %56 = arith.mulf %55, %41 : vector<16x32xf32>
    %57 = arith.mulf %50, %53 : vector<16x32xf32>
    %58 = arith.addf %56, %57 : vector<16x32xf32>
    %cst_40 = arith.constant dense<0.000000e+00> : vector<16x32xf32>
    %59 = tpu.matmul %58, %26, %cst_40 {dimension_numbers = #tpu.dot_dimension_numbers<[1], [0], [0], [1], [0, 0, 1, 1], [], []>} : vector<16x32xf32>, vector<32x32xf32>, vector<16x32xf32> -> vector<16x32xf32>
    %60 = arith.addf %22, %59 : vector<16x32xf32>
    %61 = arith.negf %60 : vector<16x32xf32>
    %62 = math.exp %61 : vector<16x32xf32>
    %cst_41 = arith.constant 1.000000e+00 : f32
    %63 = vector.broadcast %cst_41 : f32 to vector<16x32xf32>
    %64 = arith.addf %63, %62 : vector<16x32xf32>
    %65 = arith.divf %63, %64 : vector<16x32xf32>
    %66 = arith.mulf %65, %58 : vector<16x32xf32>
    %67 = vector.shape_cast %39 : vector<16x1xi1> to vector<16x1xi1>
    %68 = vector.broadcast %67 : vector<16x1xi1> to vector<16x32xi1>
    %69 = arith.select %68, %58, %28 : vector<16x32xi1>, vector<16x32xf32>
    %70 = vector.shape_cast %39 : vector<16x1xi1> to vector<16x1xi1>
    %71 = vector.broadcast %70 : vector<16x1xi1> to vector<16x32xi1>
    %72 = arith.select %71, %66, %29 : vector<16x32xi1>, vector<16x32xf32>
    %c1_i32_42 = arith.constant 1 : i32
    %73 = arith.index_cast %c1_i32_42 : i32 to index
    %74 = memref.load %arg1[%73] : memref<5xi32, #tpu.memory_space<smem>>
    %c1_i32_43 = arith.constant 1 : i32
    %75 = arith.addi %c1_i32_42, %c1_i32_43 : i32
    %76 = arith.index_cast %75 : i32 to index
    %77 = memref.load %arg1[%76] : memref<5xi32, #tpu.memory_space<smem>>
    %78 = vector.broadcast %74 : i32 to vector<16x1xi32>
    %79 = arith.cmpi sge, %27, %78 : vector<16x1xi32>
    %80 = vector.broadcast %77 : i32 to vector<16x1xi32>
    %81 = arith.cmpi slt, %27, %80 : vector<16x1xi32>
    %82 = arith.andi %79, %81 : vector<16x1xi1>
    %83 = arith.truncf %69 : vector<16x32xf32> to vector<16x32xbf16>
    %cst_44 = arith.constant dense<0.000000e+00> : vector<16x32xf32>
    %84 = tpu.matmul %23, %83, %cst_44 {dimension_numbers = #tpu.dot_dimension_numbers<[1], [0], [0], [1], [0, 0, 1, 1], [], []>} : vector<16x16xbf16>, vector<16x32xbf16>, vector<16x32xf32> -> vector<16x32xf32>
    %85 = arith.truncf %72 : vector<16x32xf32> to vector<16x32xbf16>
    %cst_45 = arith.constant dense<0.000000e+00> : vector<16x32xf32>
    %86 = tpu.matmul %23, %85, %cst_45 {dimension_numbers = #tpu.dot_dimension_numbers<[1], [0], [0], [1], [0, 0, 1, 1], [], []>} : vector<16x16xbf16>, vector<16x32xbf16>, vector<16x32xf32> -> vector<16x32xf32>
    %cst_46 = arith.constant dense<0.000000e+00> : vector<16x32xf32>
    %87 = tpu.matmul %84, %24, %cst_46 {dimension_numbers = #tpu.dot_dimension_numbers<[1], [0], [0], [1], [0, 0, 1, 1], [], []>} : vector<16x32xf32>, vector<32x32xf32>, vector<16x32xf32> -> vector<16x32xf32>
    %88 = arith.addf %12, %87 : vector<16x32xf32>
    %89 = arith.negf %88 : vector<16x32xf32>
    %90 = math.exp %89 : vector<16x32xf32>
    %cst_47 = arith.constant 1.000000e+00 : f32
    %91 = vector.broadcast %cst_47 : f32 to vector<16x32xf32>
    %92 = arith.addf %91, %90 : vector<16x32xf32>
    %93 = arith.divf %91, %92 : vector<16x32xf32>
    %cst_48 = arith.constant dense<0.000000e+00> : vector<16x32xf32>
    %94 = tpu.matmul %86, %25, %cst_48 {dimension_numbers = #tpu.dot_dimension_numbers<[1], [0], [0], [1], [0, 0, 1, 1], [], []>} : vector<16x32xf32>, vector<32x32xf32>, vector<16x32xf32> -> vector<16x32xf32>
    %95 = arith.addf %17, %94 : vector<16x32xf32>
    %96 = math.tanh %95 : vector<16x32xf32>
    %cst_49 = arith.constant 1.000000e+00 : f32
    %97 = vector.broadcast %cst_49 : f32 to vector<16x32xf32>
    %98 = arith.subf %97, %93 : vector<16x32xf32>
    %99 = arith.mulf %98, %84 : vector<16x32xf32>
    %100 = arith.mulf %93, %96 : vector<16x32xf32>
    %101 = arith.addf %99, %100 : vector<16x32xf32>
    %cst_50 = arith.constant dense<0.000000e+00> : vector<16x32xf32>
    %102 = tpu.matmul %101, %26, %cst_50 {dimension_numbers = #tpu.dot_dimension_numbers<[1], [0], [0], [1], [0, 0, 1, 1], [], []>} : vector<16x32xf32>, vector<32x32xf32>, vector<16x32xf32> -> vector<16x32xf32>
    %103 = arith.addf %22, %102 : vector<16x32xf32>
    %104 = arith.negf %103 : vector<16x32xf32>
    %105 = math.exp %104 : vector<16x32xf32>
    %cst_51 = arith.constant 1.000000e+00 : f32
    %106 = vector.broadcast %cst_51 : f32 to vector<16x32xf32>
    %107 = arith.addf %106, %105 : vector<16x32xf32>
    %108 = arith.divf %106, %107 : vector<16x32xf32>
    %109 = arith.mulf %108, %101 : vector<16x32xf32>
    %110 = vector.shape_cast %82 : vector<16x1xi1> to vector<16x1xi1>
    %111 = vector.broadcast %110 : vector<16x1xi1> to vector<16x32xi1>
    %112 = arith.select %111, %101, %69 : vector<16x32xi1>, vector<16x32xf32>
    %113 = vector.shape_cast %82 : vector<16x1xi1> to vector<16x1xi1>
    %114 = vector.broadcast %113 : vector<16x1xi1> to vector<16x32xi1>
    %115 = arith.select %114, %109, %72 : vector<16x32xi1>, vector<16x32xf32>
    %c2_i32 = arith.constant 2 : i32
    %116 = arith.index_cast %c2_i32 : i32 to index
    %117 = memref.load %arg1[%116] : memref<5xi32, #tpu.memory_space<smem>>
    %c1_i32_52 = arith.constant 1 : i32
    %118 = arith.addi %c2_i32, %c1_i32_52 : i32
    %119 = arith.index_cast %118 : i32 to index
    %120 = memref.load %arg1[%119] : memref<5xi32, #tpu.memory_space<smem>>
    %121 = vector.broadcast %117 : i32 to vector<16x1xi32>
    %122 = arith.cmpi sge, %27, %121 : vector<16x1xi32>
    %123 = vector.broadcast %120 : i32 to vector<16x1xi32>
    %124 = arith.cmpi slt, %27, %123 : vector<16x1xi32>
    %125 = arith.andi %122, %124 : vector<16x1xi1>
    %126 = arith.truncf %112 : vector<16x32xf32> to vector<16x32xbf16>
    %cst_53 = arith.constant dense<0.000000e+00> : vector<16x32xf32>
    %127 = tpu.matmul %23, %126, %cst_53 {dimension_numbers = #tpu.dot_dimension_numbers<[1], [0], [0], [1], [0, 0, 1, 1], [], []>} : vector<16x16xbf16>, vector<16x32xbf16>, vector<16x32xf32> -> vector<16x32xf32>
    %128 = arith.truncf %115 : vector<16x32xf32> to vector<16x32xbf16>
    %cst_54 = arith.constant dense<0.000000e+00> : vector<16x32xf32>
    %129 = tpu.matmul %23, %128, %cst_54 {dimension_numbers = #tpu.dot_dimension_numbers<[1], [0], [0], [1], [0, 0, 1, 1], [], []>} : vector<16x16xbf16>, vector<16x32xbf16>, vector<16x32xf32> -> vector<16x32xf32>
    %cst_55 = arith.constant dense<0.000000e+00> : vector<16x32xf32>
    %130 = tpu.matmul %127, %24, %cst_55 {dimension_numbers = #tpu.dot_dimension_numbers<[1], [0], [0], [1], [0, 0, 1, 1], [], []>} : vector<16x32xf32>, vector<32x32xf32>, vector<16x32xf32> -> vector<16x32xf32>
    %131 = arith.addf %12, %130 : vector<16x32xf32>
    %132 = arith.negf %131 : vector<16x32xf32>
    %133 = math.exp %132 : vector<16x32xf32>
    %cst_56 = arith.constant 1.000000e+00 : f32
    %134 = vector.broadcast %cst_56 : f32 to vector<16x32xf32>
    %135 = arith.addf %134, %133 : vector<16x32xf32>
    %136 = arith.divf %134, %135 : vector<16x32xf32>
    %cst_57 = arith.constant dense<0.000000e+00> : vector<16x32xf32>
    %137 = tpu.matmul %129, %25, %cst_57 {dimension_numbers = #tpu.dot_dimension_numbers<[1], [0], [0], [1], [0, 0, 1, 1], [], []>} : vector<16x32xf32>, vector<32x32xf32>, vector<16x32xf32> -> vector<16x32xf32>
    %138 = arith.addf %17, %137 : vector<16x32xf32>
    %139 = math.tanh %138 : vector<16x32xf32>
    %cst_58 = arith.constant 1.000000e+00 : f32
    %140 = vector.broadcast %cst_58 : f32 to vector<16x32xf32>
    %141 = arith.subf %140, %136 : vector<16x32xf32>
    %142 = arith.mulf %141, %127 : vector<16x32xf32>
    %143 = arith.mulf %136, %139 : vector<16x32xf32>
    %144 = arith.addf %142, %143 : vector<16x32xf32>
    %cst_59 = arith.constant dense<0.000000e+00> : vector<16x32xf32>
    %145 = tpu.matmul %144, %26, %cst_59 {dimension_numbers = #tpu.dot_dimension_numbers<[1], [0], [0], [1], [0, 0, 1, 1], [], []>} : vector<16x32xf32>, vector<32x32xf32>, vector<16x32xf32> -> vector<16x32xf32>
    %146 = arith.addf %22, %145 : vector<16x32xf32>
    %147 = arith.negf %146 : vector<16x32xf32>
    %148 = math.exp %147 : vector<16x32xf32>
    %cst_60 = arith.constant 1.000000e+00 : f32
    %149 = vector.broadcast %cst_60 : f32 to vector<16x32xf32>
    %150 = arith.addf %149, %148 : vector<16x32xf32>
    %151 = arith.divf %149, %150 : vector<16x32xf32>
    %152 = arith.mulf %151, %144 : vector<16x32xf32>
    %153 = vector.shape_cast %125 : vector<16x1xi1> to vector<16x1xi1>
    %154 = vector.broadcast %153 : vector<16x1xi1> to vector<16x32xi1>
    %155 = arith.select %154, %144, %112 : vector<16x32xi1>, vector<16x32xf32>
    %156 = vector.shape_cast %125 : vector<16x1xi1> to vector<16x1xi1>
    %157 = vector.broadcast %156 : vector<16x1xi1> to vector<16x32xi1>
    %158 = arith.select %157, %152, %115 : vector<16x32xi1>, vector<16x32xf32>
    %c3_i32 = arith.constant 3 : i32
    %159 = arith.index_cast %c3_i32 : i32 to index
    %160 = memref.load %arg1[%159] : memref<5xi32, #tpu.memory_space<smem>>
    %c1_i32_61 = arith.constant 1 : i32
    %161 = arith.addi %c3_i32, %c1_i32_61 : i32
    %162 = arith.index_cast %161 : i32 to index
    %163 = memref.load %arg1[%162] : memref<5xi32, #tpu.memory_space<smem>>
    %164 = vector.broadcast %160 : i32 to vector<16x1xi32>
    %165 = arith.cmpi sge, %27, %164 : vector<16x1xi32>
    %166 = vector.broadcast %163 : i32 to vector<16x1xi32>
    %167 = arith.cmpi slt, %27, %166 : vector<16x1xi32>
    %168 = arith.andi %165, %167 : vector<16x1xi1>
    %169 = arith.truncf %155 : vector<16x32xf32> to vector<16x32xbf16>
    %cst_62 = arith.constant dense<0.000000e+00> : vector<16x32xf32>
    %170 = tpu.matmul %23, %169, %cst_62 {dimension_numbers = #tpu.dot_dimension_numbers<[1], [0], [0], [1], [0, 0, 1, 1], [], []>} : vector<16x16xbf16>, vector<16x32xbf16>, vector<16x32xf32> -> vector<16x32xf32>
    %171 = arith.truncf %158 : vector<16x32xf32> to vector<16x32xbf16>
    %cst_63 = arith.constant dense<0.000000e+00> : vector<16x32xf32>
    %172 = tpu.matmul %23, %171, %cst_63 {dimension_numbers = #tpu.dot_dimension_numbers<[1], [0], [0], [1], [0, 0, 1, 1], [], []>} : vector<16x16xbf16>, vector<16x32xbf16>, vector<16x32xf32> -> vector<16x32xf32>
    %cst_64 = arith.constant dense<0.000000e+00> : vector<16x32xf32>
    %173 = tpu.matmul %170, %24, %cst_64 {dimension_numbers = #tpu.dot_dimension_numbers<[1], [0], [0], [1], [0, 0, 1, 1], [], []>} : vector<16x32xf32>, vector<32x32xf32>, vector<16x32xf32> -> vector<16x32xf32>
    %174 = arith.addf %12, %173 : vector<16x32xf32>
    %175 = arith.negf %174 : vector<16x32xf32>
    %176 = math.exp %175 : vector<16x32xf32>
    %cst_65 = arith.constant 1.000000e+00 : f32
    %177 = vector.broadcast %cst_65 : f32 to vector<16x32xf32>
    %178 = arith.addf %177, %176 : vector<16x32xf32>
    %179 = arith.divf %177, %178 : vector<16x32xf32>
    %cst_66 = arith.constant dense<0.000000e+00> : vector<16x32xf32>
    %180 = tpu.matmul %172, %25, %cst_66 {dimension_numbers = #tpu.dot_dimension_numbers<[1], [0], [0], [1], [0, 0, 1, 1], [], []>} : vector<16x32xf32>, vector<32x32xf32>, vector<16x32xf32> -> vector<16x32xf32>
    %181 = arith.addf %17, %180 : vector<16x32xf32>
    %182 = math.tanh %181 : vector<16x32xf32>
    %cst_67 = arith.constant 1.000000e+00 : f32
    %183 = vector.broadcast %cst_67 : f32 to vector<16x32xf32>
    %184 = arith.subf %183, %179 : vector<16x32xf32>
    %185 = arith.mulf %184, %170 : vector<16x32xf32>
    %186 = arith.mulf %179, %182 : vector<16x32xf32>
    %187 = arith.addf %185, %186 : vector<16x32xf32>
    %cst_68 = arith.constant dense<0.000000e+00> : vector<16x32xf32>
    %188 = tpu.matmul %187, %26, %cst_68 {dimension_numbers = #tpu.dot_dimension_numbers<[1], [0], [0], [1], [0, 0, 1, 1], [], []>} : vector<16x32xf32>, vector<32x32xf32>, vector<16x32xf32> -> vector<16x32xf32>
    %189 = arith.addf %22, %188 : vector<16x32xf32>
    %190 = arith.negf %189 : vector<16x32xf32>
    %191 = math.exp %190 : vector<16x32xf32>
    %cst_69 = arith.constant 1.000000e+00 : f32
    %192 = vector.broadcast %cst_69 : f32 to vector<16x32xf32>
    %193 = arith.addf %192, %191 : vector<16x32xf32>
    %194 = arith.divf %192, %193 : vector<16x32xf32>
    %195 = arith.mulf %194, %187 : vector<16x32xf32>
    %196 = vector.shape_cast %168 : vector<16x1xi1> to vector<16x1xi1>
    %197 = vector.broadcast %196 : vector<16x1xi1> to vector<16x32xi1>
    %198 = arith.select %197, %187, %155 : vector<16x32xi1>, vector<16x32xf32>
    %199 = vector.shape_cast %168 : vector<16x1xi1> to vector<16x1xi1>
    %200 = vector.broadcast %199 : vector<16x1xi1> to vector<16x32xi1>
    %201 = arith.select %200, %195, %158 : vector<16x32xi1>, vector<16x32xf32>
    %c4_i32 = arith.constant 4 : i32
    %c0_70 = arith.constant 0 : index
    %c0_71 = arith.constant 0 : index
    %202 = vector.load %arg7[%c0_70, %c0_71] : memref<16x16xbf16, #tpu.memory_space<vmem>>, vector<16x16xbf16>
    %203 = arith.truncf %198 : vector<16x32xf32> to vector<16x32xbf16>
    %cst_72 = arith.constant dense<0.000000e+00> : vector<16x32xf32>
    %204 = tpu.matmul %202, %203, %cst_72 {dimension_numbers = #tpu.dot_dimension_numbers<[1], [0], [0], [1], [0, 0, 1, 1], [], []>} : vector<16x16xbf16>, vector<16x32xbf16>, vector<16x32xf32> -> vector<16x32xf32>
    %c0_73 = arith.constant 0 : index
    %c0_74 = arith.constant 0 : index
    %205 = vector.load %arg17[%c0_73, %c0_74] : memref<32x32xf32, #tpu.memory_space<vmem>>, vector<32x32xf32>
    %cst_75 = arith.constant dense<0.000000e+00> : vector<16x32xf32>
    %206 = tpu.matmul %2, %205, %cst_75 {dimension_numbers = #tpu.dot_dimension_numbers<[1], [0], [0], [1], [0, 0, 1, 1], [], []>} : vector<16x32xf32>, vector<32x32xf32>, vector<16x32xf32> -> vector<16x32xf32>
    %c0_76 = arith.constant 0 : index
    %c0_77 = arith.constant 0 : index
    %207 = vector.load %arg18[%c0_76, %c0_77] : memref<32x32xf32, #tpu.memory_space<vmem>>, vector<32x32xf32>
    %cst_78 = arith.constant dense<0.000000e+00> : vector<16x32xf32>
    %208 = tpu.matmul %204, %207, %cst_78 {dimension_numbers = #tpu.dot_dimension_numbers<[1], [0], [0], [1], [0, 0, 1, 1], [], []>} : vector<16x32xf32>, vector<32x32xf32>, vector<16x32xf32> -> vector<16x32xf32>
    %209 = arith.addf %206, %208 : vector<16x32xf32>
    %c0_79 = arith.constant 0 : index
    %c0_80 = arith.constant 0 : index
    %210 = vector.load %arg19[%c0_79, %c0_80] : memref<1x32xf32, #tpu.memory_space<vmem>>, vector<1x32xf32>
    %211 = vector.broadcast %210 : vector<1x32xf32> to vector<16x32xf32>
    %212 = arith.addf %209, %211 : vector<16x32xf32>
    %cst_81 = arith.constant 0.000000e+00 : f32
    %213 = vector.broadcast %cst_81 : f32 to vector<16x32xf32>
    %214 = arith.maximumf %212, %213 : vector<16x32xf32>
    %c0_82 = arith.constant 0 : index
    %c0_83 = arith.constant 0 : index
    %215 = vector.load %arg20[%c0_82, %c0_83] : memref<16x32xf32, #tpu.memory_space<vmem>>, vector<16x32xf32>
    tpu.vector_store %arg20[%c0_82, %c0_83], %214 {strides = array<i32>} : memref<16x32xf32, #tpu.memory_space<vmem>>, vector<16x32xf32>,
    return
  }
  func.func @transform_0(%arg0: i32, %arg1: memref<5xi32, #tpu.memory_space<smem>>) -> (i32, i32) {
    %c0_i32 = arith.constant 0 : i32
    %c0_i32_0 = arith.constant 0 : i32
    %c0_i32_1 = arith.constant 0 : i32
    return %c0_i32, %c0_i32_0 : i32, i32
  }
  func.func @transform_1(%arg0: i32, %arg1: memref<5xi32, #tpu.memory_space<smem>>) -> (i32, i32) {
    %c0_i32 = arith.constant 0 : i32
    %c0_i32_0 = arith.constant 0 : i32
    %c0_i32_1 = arith.constant 0 : i32
    return %c0_i32, %c0_i32_0 : i32, i32
  }
  func.func @transform_2(%arg0: i32, %arg1: memref<5xi32, #tpu.memory_space<smem>>) -> (i32, i32) {
    %c0_i32 = arith.constant 0 : i32
    %c0_i32_0 = arith.constant 0 : i32
    %c0_i32_1 = arith.constant 0 : i32
    return %c0_i32, %c0_i32_0 : i32, i32
  }
  func.func @transform_3(%arg0: i32, %arg1: memref<5xi32, #tpu.memory_space<smem>>) -> (i32, i32) {
    %c0_i32 = arith.constant 0 : i32
    %c0_i32_0 = arith.constant 0 : i32
    %c0_i32_1 = arith.constant 0 : i32
    return %c0_i32, %c0_i32_0 : i32, i32
  }
  func.func @transform_4(%arg0: i32, %arg1: memref<5xi32, #tpu.memory_space<smem>>) -> (i32, i32) {
    %c0_i32 = arith.constant 0 : i32
    %c0_i32_0 = arith.constant 0 : i32
    %c0_i32_1 = arith.constant 0 : i32
    return %c0_i32, %c0_i32_0 : i32, i32
  }
  func.func @transform_5(%arg0: i32, %arg1: memref<5xi32, #tpu.memory_space<smem>>) -> (i32, i32) {
    %c0_i32 = arith.constant 0 : i32
    %c0_i32_0 = arith.constant 0 : i32
    %c0_i32_1 = arith.constant 0 : i32
    return %c0_i32, %c0_i32_0 : i32, i32
  }
  func.func @transform_6(%arg0: i32, %arg1: memref<5xi32, #tpu.memory_space<smem>>) -> (i32, i32) {
    %c0_i32 = arith.constant 0 : i32
    %c0_i32_0 = arith.constant 0 : i32
    %c0_i32_1 = arith.constant 0 : i32
    return %c0_i32, %c0_i32_0 : i32, i32
  }
  func.func @transform_7(%arg0: i32, %arg1: memref<5xi32, #tpu.memory_space<smem>>) -> (i32, i32) {
    %c0_i32 = arith.constant 0 : i32
    %c0_i32_0 = arith.constant 0 : i32
    %c0_i32_1 = arith.constant 0 : i32
    return %c0_i32, %c0_i32_0 : i32, i32
  }
  func.func @transform_8(%arg0: i32, %arg1: memref<5xi32, #tpu.memory_space<smem>>) -> (i32, i32) {
    %c0_i32 = arith.constant 0 : i32
    %c0_i32_0 = arith.constant 0 : i32
    %c0_i32_1 = arith.constant 0 : i32
    return %c0_i32, %c0_i32_0 : i32, i32
  }
  func.func @transform_9(%arg0: i32, %arg1: memref<5xi32, #tpu.memory_space<smem>>) -> (i32, i32) {
    %c0_i32 = arith.constant 0 : i32
    %c0_i32_0 = arith.constant 0 : i32
    %c0_i32_1 = arith.constant 0 : i32
    return %c0_i32, %c0_i32_0 : i32, i32
  }
  func.func @transform_10(%arg0: i32, %arg1: memref<5xi32, #tpu.memory_space<smem>>) -> (i32, i32) {
    %c0_i32 = arith.constant 0 : i32
    %c0_i32_0 = arith.constant 0 : i32
    %c0_i32_1 = arith.constant 0 : i32
    return %c0_i32, %c0_i32_0 : i32, i32
  }
  func.func @transform_11(%arg0: i32, %arg1: memref<5xi32, #tpu.memory_space<smem>>) -> (i32, i32) {
    %c0_i32 = arith.constant 0 : i32
    %c0_i32_0 = arith.constant 0 : i32
    %c0_i32_1 = arith.constant 0 : i32
    return %c0_i32, %c0_i32_0 : i32, i32
  }
  func.func @transform_12(%arg0: i32, %arg1: memref<5xi32, #tpu.memory_space<smem>>) -> (i32, i32) {
    %c0_i32 = arith.constant 0 : i32
    %c0_i32_0 = arith.constant 0 : i32
    %c0_i32_1 = arith.constant 0 : i32
    return %c0_i32, %c0_i32_0 : i32, i32
  }
  func.func @transform_13(%arg0: i32, %arg1: memref<5xi32, #tpu.memory_space<smem>>) -> (i32, i32) {
    %c0_i32 = arith.constant 0 : i32
    %c0_i32_0 = arith.constant 0 : i32
    %c0_i32_1 = arith.constant 0 : i32
    return %c0_i32, %c0_i32_0 : i32, i32
  }
  func.func @transform_14(%arg0: i32, %arg1: memref<5xi32, #tpu.memory_space<smem>>) -> (i32, i32) {
    %c0_i32 = arith.constant 0 : i32
    %c0_i32_0 = arith.constant 0 : i32
    %c0_i32_1 = arith.constant 0 : i32
    return %c0_i32, %c0_i32_0 : i32, i32
  }
  func.func @transform_15(%arg0: i32, %arg1: memref<5xi32, #tpu.memory_space<smem>>) -> (i32, i32) {
    %c0_i32 = arith.constant 0 : i32
    %c0_i32_0 = arith.constant 0 : i32
    %c0_i32_1 = arith.constant 0 : i32
    return %c0_i32, %c0_i32_0 : i32, i32
  }
  func.func @transform_16(%arg0: i32, %arg1: memref<5xi32, #tpu.memory_space<smem>>) -> (i32, i32) {
    %c0_i32 = arith.constant 0 : i32
    %c0_i32_0 = arith.constant 0 : i32
    %c0_i32_1 = arith.constant 0 : i32
    return %c0_i32, %c0_i32_0 : i32, i32
  }
  func.func @transform_17(%arg0: i32, %arg1: memref<5xi32, #tpu.memory_space<smem>>) -> (i32, i32) {
    %c0_i32 = arith.constant 0 : i32
    %c0_i32_0 = arith.constant 0 : i32
    %c0_i32_1 = arith.constant 0 : i32
    return %c0_i32, %c0_i32_0 : i32, i32
  }
  func.func @transform_18(%arg0: i32, %arg1: memref<5xi32, #tpu.memory_space<smem>>) -> (i32, i32) {
    %c0_i32 = arith.constant 0 : i32
    %c0_i32_0 = arith.constant 0 : i32
    %c0_i32_1 = arith.constant 0 : i32
    return %c0_i32, %c0_i32_0 : i32, i32
  }
}

</mosaic_0001>

<bundles_post_ra>
// kernel: tpu_custom_call.1
= control target key start
LH: loop header
LB: loop body
LE: loop exit
PB: predicated region body
PF: predicated region fallthrough
CT: control target
= control target key end

     0   :  { %s2043_s21 = smov [#allocation3]   ;;  %s2637_s0 = inlined_call_operand.hbm [shape: s32[5], index: 0, kind: input, shape index: {}]   ;;  %s2638_s1 = inlined_call_operand.hbm [shape: bf16[16,20], index: 1, kind: input, shape index: {}]   ;;  %s2639_s2 = inlined_call_operand.hbm [shape: bf16[20,32], index: 2, kind: input, shape index: {}]   ;;  %s2640_s3 = inlined_call_operand.hbm [shape: bf16[16,16], index: 3, kind: input, shape index: {}]   ;;  %s2641_s4 = inlined_call_operand.hbm [shape: bf16[16,16], index: 4, kind: input, shape index: {}]   ;;  %s2642_s5 = inlined_call_operand.hbm [shape: bf16[16,16], index: 5, kind: input, shape index: {}]   ;;  %s2643_s6 = inlined_call_operand.hbm [shape: bf16[16,16], index: 6, kind: input, shape index: {}]   ;;  %s2644_s7 = inlined_call_operand.hbm [shape: f32[32,32], index: 7, kind: input, shape index: {}]   ;;  %s2645_s8 = inlined_call_operand.vmem [shape: f32[1,32], index: 8, kind: input, shape index: {}]   ;;  %s2646_s9 = inlined_call_operand.hbm [shape: f32[32,32], index: 9, kind: input, shape index: {}]   ;;  %s2647_s10 = inlined_call_operand.hbm [shape: f32[32,32], index: 10, kind: input, shape index: {}]   ;;  %s2648_s11 = inlined_call_operand.vmem [shape: f32[1,32], index: 11, kind: input, shape index: {}]   ;;  %s2649_s12 = inlined_call_operand.hbm [shape: f32[32,32], index: 12, kind: input, shape index: {}]   ;;  %s2650_s13 = inlined_call_operand.hbm [shape: f32[32,32], index: 13, kind: input, shape index: {}]   ;;  %s2651_s14 = inlined_call_operand.vmem [shape: f32[1,32], index: 14, kind: input, shape index: {}]   ;;  %s2652_s15 = inlined_call_operand.hbm [shape: f32[32,32], index: 15, kind: input, shape index: {}]   ;;  %s2653_s16 = inlined_call_operand.hbm [shape: f32[32,32], index: 16, kind: input, shape index: {}]   ;;  %s2654_s17 = inlined_call_operand.hbm [shape: f32[32,32], index: 17, kind: input, shape index: {}]   ;;  %s2655_s18 = inlined_call_operand.vmem [shape: f32[1,32], index: 18, kind: input, shape index: {}]   ;;  %s2656_s19 = inlined_call_operand.hbm [shape: f32[16,32], index: 19, kind: output, shape index: {}]  }
   0x1   :  { %2657 = sst [smem:[#allocation38_spill]] %s2637_s0 }
   0x2   :  { %2658 = sst [smem:[#allocation39_spill]] %s2638_s1 }
   0x3   :  { %2659 = sst [smem:[#allocation40_spill]] %s2639_s2 }
   0x4   :  { %2660 = sst [smem:[#allocation41_spill]] %s2640_s3 }
   0x5   :  { %2661 = sst [smem:[#allocation42_spill]] %s2648_s11 }
   0x6   :  { %s2662_s20 = sld [smem:[#allocation38_spill]] }
   0xc   :  { %s25_s11 = sshll.u32 %s2662_s20, 4  ;;  %s26_s11 = int_to_ptr.hbm [resolvable:$true] %s25_s11 }
   0xd   :  { %28 = dma.hbm_to_smem %s26_s11, 16, %s2043_s21, [#allocation2] }
   0xe   :  { %2023 = dma.done.wait [#allocation2], 16 }
   0xf   :  { %2024 = vsyncadd [#allocation2], 4294967280 }
  0x10   :  { %31 = sfence }
  0x11   :  { %32 = vsyncpa [#allocation5], 0 }
  0x12   :  { %33 = vsyncpa [#allocation8], 0 }
  0x13   :  { %34 = vsyncpa [#allocation11], 0 }
  0x14   :  { %35 = vsyncpa [#allocation14], 0 }
  0x15   :  { %36 = vsyncpa [#allocation17], 0 }
  0x16   :  { %37 = vsyncpa [#allocation20], 0 }
  0x17   :  { %38 = vsyncpa [#allocation23], 0 }
  0x18   :  { %39 = vsyncpa [#allocation26], 0 }
  0x19   :  { %40 = vsyncpa [#allocation6], 0  ;;  %s2663_s2 = sld [smem:[#allocation40_spill]]  ;;  %s2044_s24 = smov [#allocation7]  }
  0x1a   :  { %s60_s25 = sshll.u32 %s2044_s24, 4  ;;  %s84_s26 = sshll.u32 %s2641_s4, 4  ;;  %s61_s25 = int_to_ptr.vmem [resolvable:$true] %s60_s25  ;;  %s85_s26 = int_to_ptr.hbm [resolvable:$true] %s84_s26 }
  0x1b   :  { %s2045_s27 = smov 64   ;;  %s2046_s28 = smov 4  }
  0x1c   :  { %s2047_s29 = smov [#allocation10]   ;;  %s110_s21 = sshll.u32 %s2643_s6, 4  ;;  %s111_s21 = int_to_ptr.hbm [resolvable:$true] %s110_s21 }
  0x1d   :  { %s86_s0 = sshll.u32 %s2047_s29, 4  ;;  %s2048_s4 = smov [#allocation13]   ;;  %s87_s0 = int_to_ptr.vmem [resolvable:$true] %s86_s0 }
  0x1e   :  { %92 = dma.hbm_to_vmem [thread:$0]  %s85_s26, 128, %s87_s0, [#allocation11], %s2045_s27, %s2045_s27, %s2046_s28  }
  0x1f   :  { %s58_s23 = sshll.u32 %s2663_s2, 4  ;;  %s112_s1 = sshll.u32 %s2048_s4, 4  ;;  %s59_s23 = int_to_ptr.hbm [resolvable:$true] %s58_s23  ;;  %s113_s1 = int_to_ptr.vmem [resolvable:$true] %s112_s1 }
  0x20   :  { %66 = dma.hbm_to_vmem [thread:$0]  %s59_s23, 192, %s61_s25, [#allocation8], %s2045_s27, %s2045_s27, %s2046_s28  }
  0x21   :  { %s138_s23 = sshll.u32 %s2646_s9, 4  ;;  %s2049_s24 = smov [#allocation16]   ;;  %s139_s23 = int_to_ptr.hbm [resolvable:$true] %s138_s23 }
  0x22   :  { %118 = dma.hbm_to_vmem [thread:$0]  %s111_s21, 128, %s113_s1, [#allocation14], %s2045_s27, %s2045_s27, %s2046_s28  }
  0x23   :  { %s140_s6 = sshll.u32 %s2049_s24, 4  ;;  %s166_s3 = sshll.u32 %s2649_s12, 4  ;;  %s141_s6 = int_to_ptr.vmem [resolvable:$true] %s140_s6  ;;  %s167_s3 = int_to_ptr.hbm [resolvable:$true] %s166_s3 }
  0x24   :  { %s2050_s26 = smov 128   ;;  %s2051_s29 = smov 8  }
  0x25   :  { %146 = dma.hbm_to_vmem [thread:$0]  %s139_s23, 512, %s141_s6, [#allocation17], %s2050_s26, %s2050_s26, %s2051_s29  }
  0x26   :  { %s194_s30 = sshll.u32 %s2652_s15, 4  ;;  %s2052_s20 = smov [#allocation19]   ;;  %s195_s30 = int_to_ptr.hbm [resolvable:$true] %s194_s30 }
  0x27   :  { %s168_s21 = sshll.u32 %s2052_s20, 4  ;;  %s2053_s12 = smov [#allocation22]   ;;  %s169_s21 = int_to_ptr.vmem [resolvable:$true] %s168_s21 }
  0x28   :  { %174 = dma.hbm_to_vmem [thread:$0]  %s167_s3, 512, %s169_s21, [#allocation20], %s2050_s26, %s2050_s26, %s2051_s29  }
  0x29   :  { %s196_s4 = sshll.u32 %s2053_s12, 4  ;;  %s2664_s2 = sld [smem:[#allocation39_spill]]  ;;  %s197_s4 = int_to_ptr.vmem [resolvable:$true] %s196_s4 }
  0x2a   :  { %202 = dma.hbm_to_vmem [thread:$0]  %s195_s30, 512, %s197_s4, [#allocation23], %s2050_s26, %s2050_s26, %s2051_s29  }
  0x2b   :  { %s2665_s6 = sld [smem:[#allocation41_spill]]  ;;  %s2054_s11 = smov [#allocation4]  }
  0x2c   :  { %s47_s9 = sshll.u32 %s2054_s11, 4  ;;  %s2055_s3 = smov [#allocation9]   ;;  %s48_s9 = int_to_ptr.vmem [resolvable:$true] %s47_s9 }
  0x2d   :  { %s73_s0 = sshll.u32 %s2055_s3, 4  ;;  %s97_s12 = sshll.u32 %s2642_s5, 4  ;;  %s74_s0 = int_to_ptr.vmem [resolvable:$true] %s73_s0  ;;  %s98_s12 = int_to_ptr.hbm [resolvable:$true] %s97_s12 }
  0x2e   :  { %s123_s1 = sshll.u32 %s2644_s7, 4  ;;  %s2056_s22 = smov [#allocation12]   ;;  %s124_s1 = int_to_ptr.hbm [resolvable:$true] %s123_s1 }
  0x2f   :  { %s45_s24 = sshll.u32 %s2664_s2, 4  ;;  %s99_s2 = sshll.u32 %s2056_s22, 4  ;;  %s46_s24 = int_to_ptr.hbm [resolvable:$true] %s45_s24  ;;  %s100_s2 = int_to_ptr.vmem [resolvable:$true] %s99_s2 }
  0x30   :  { %53 = dma.hbm_to_vmem [thread:$0]  %s46_s24, 128, %s48_s9, [#allocation5], %s2045_s27, %s2045_s27, %s2046_s28  }
  0x31   :  { %s71_s25 = sshll.u32 %s2665_s6, 4  ;;  %s2057_s24 = smov [#allocation15]   ;;  %s72_s25 = int_to_ptr.hbm [resolvable:$true] %s71_s25 }
  0x32   :  { %79 = dma.hbm_to_vmem [thread:$0]  %s72_s25, 128, %s74_s0, [#allocation8], %s2045_s27, %s2045_s27, %s2046_s28  }
  0x33   :  { %105 = dma.hbm_to_vmem [thread:$0]  %s98_s12, 128, %s100_s2, [#allocation11], %s2045_s27, %s2045_s27, %s2046_s28  }
  0x34   :  { %s125_s5 = sshll.u32 %s2057_s24, 4  ;;  %s151_s6 = sshll.u32 %s2647_s10, 4  ;;  %s126_s5 = int_to_ptr.vmem [resolvable:$true] %s125_s5  ;;  %s152_s6 = int_to_ptr.hbm [resolvable:$true] %s151_s6 }
  0x35   :  { %131 = dma.hbm_to_vmem [thread:$0]  %s124_s1, 512, %s126_s5, [#allocation14], %s2050_s26, %s2050_s26, %s2051_s29  }
  0x36   :  { %s179_s11 = sshll.u32 %s2650_s13, 4  ;;  %s2058_s9 = smov [#allocation18]   ;;  %s180_s11 = int_to_ptr.hbm [resolvable:$true] %s179_s11 }
  0x37   :  { %s153_s3 = sshll.u32 %s2058_s9, 4  ;;  %s2059_s27 = smov [#allocation21]   ;;  %s154_s3 = int_to_ptr.vmem [resolvable:$true] %s153_s3 }
  0x38   :  { %159 = dma.hbm_to_vmem [thread:$0]  %s152_s6, 512, %s154_s3, [#allocation17], %s2050_s26, %s2050_s26, %s2051_s29  }
  0x39   :  { %s181_s10 = sshll.u32 %s2059_s27, 4  ;;  %s207_s20 = sshll.u32 %s2653_s16, 4  ;;  %s182_s10 = int_to_ptr.vmem [resolvable:$true] %s181_s10  ;;  %s208_s20 = int_to_ptr.hbm [resolvable:$true] %s207_s20 }
  0x3a   :  { %187 = dma.hbm_to_vmem [thread:$0]  %s180_s11, 512, %s182_s10, [#allocation20], %s2050_s26, %s2050_s26, %s2051_s29  }
  0x3b   :  { %s220_s12 = sshll.u32 %s2654_s17, 4  ;;  %s2060_s30 = smov [#allocation24]   ;;  %s221_s12 = int_to_ptr.hbm [resolvable:$true] %s220_s12 }
  0x3c   :  { %s209_s4 = sshll.u32 %s2060_s30, 4  ;;  %s2061_s1 = smov [#allocation25]   ;;  %s210_s4 = int_to_ptr.vmem [resolvable:$true] %s209_s4 }
  0x3d   :  { %215 = dma.hbm_to_vmem [thread:$0]  %s208_s20, 512, %s210_s4, [#allocation23], %s2050_s26, %s2050_s26, %s2051_s29  }
  0x3e   :  { %s222_s16 = sshll.u32 %s2061_s1, 4  ;;  %s223_s16 = int_to_ptr.vmem [resolvable:$true] %s222_s16 }
  0x3f   :  { %228 = dma.hbm_to_vmem [thread:$0]  %s221_s12, 512, %s223_s16, [#allocation26], %s2050_s26, %s2050_s26, %s2051_s29  }
  0x40   :  { %2025 = dma.done.wait [#allocation5], 128  }
  0x41   :  { %2026 = vsyncadd [#allocation5], 4294967168 }
  0x42   :  { %2027 = dma.done.wait [#allocation8], 320  }
  0x43   :  { %2028 = vsyncadd [#allocation8], 4294966976 }
  0x44   :  { %2029 = dma.done.wait [#allocation11], 256  }
  0x45   :  { %2030 = vsyncadd [#allocation11], 4294967040 }
  0x46   :  { %2031 = dma.done.wait [#allocation14], 640  }
  0x47   :  { %2032 = vsyncadd [#allocation14], 4294966656 }
  0x48   :  { %2033 = dma.done.wait [#allocation17], 1024  }
  0x49   :  { %2034 = vsyncadd [#allocation17], 4294966272 }
  0x4a   :  { %2035 = dma.done.wait [#allocation20], 1024  }
  0x4b   :  { %2036 = vsyncadd [#allocation20], 4294966272 }
  0x4c   :  { %2037 = dma.done.wait [#allocation23], 1024  }
  0x4d   :  { %2038 = vsyncadd [#allocation23], 4294966272 }
  0x4e   :  { %2039 = dma.done.wait [#allocation26], 512  }
  0x4f   :  { %2040 = vsyncadd [#allocation26], 4294966784  ;;  %v292_v0 = vld [vmem:[#allocation7 + $0x8] sm:$0x3]  ;;  %vm311_vm0 = vcmask 1041408   ;;  %v1544_v4 = vld [vmem:[#allocation7] sm:$0xff] }
  0x50   :  { %v303_v1 = vunpack.c.l.b16 %v292_v0  ;;  %v1543_v5 = vld [vmem:[#allocation4] sm:$0xff]  ;;  %vm307_vm1 = vcmask 162816   ;;  %v382_v7 = vld [vmem:[#allocation15 + $0x18] sm:$0xff]  ;;  %v2062_v8 = vmov 0   ;;  %vm337_vm2 = vcmask 130048   ;;  %v1545_v15 = vld [vmem:[#allocation9] sm:$0xff] }
  0x51   :  { %v2251_v6 = vld [vmem:[#allocation12] sm:$0xff]  ;;  %406 = vmatpush.msra.mxu3 %v382_v7  ;;  %v380_v10 = vld [vmem:[#allocation15 + $0x8] sm:$0xff]  ;;  %v420_v14 = vld [vmem:[#allocation18 + $0x18] sm:$0xff]  ;;  %vm387_vm3 = vcmask 261120   ;;  %s2666_s24 = sld [smem:[#allocation42_spill]]  ;;  %s2063_s3 = smov [#allocation27]  }
  0x52   :  { %v305_v2 = vpack.c.b16 %v303_v1, %v303_v1  ;;  %v381_v9 = vld [vmem:[#allocation15 + $0x10] sm:$0xff]  ;;  %v418_v17 = vld [vmem:[#allocation18 + $0x8] sm:$0xff]  ;;  %v379_v18 = vld [vmem:[#allocation15] sm:$0xff]  ;;  %s2342_s5 = sld [smem:[#allocation3]]  ;;  %s1430_s27 = sshll.u32 %s2063_s3, 4  ;;  %s1431_s27 = int_to_ptr.vmem [resolvable:$true] %s1430_s27 }
  0x53   :  { %407 = vmatpush.msra.mxu3 %v381_v9  ;;  %v419_v16 = vld [vmem:[#allocation18 + $0x10] sm:$0xff]  ;;  %v417_v19 = vld [vmem:[#allocation18] sm:$0xff]  ;;  %v2262_v20 = vld [vmem:[#allocation16 + $0x18] sm:$0xff]  ;;  %s1477_s15 = sld [smem:[#allocation3 + $0x1]]  ;;  %s1432_s0 = sshll.u32 %s2656_s19, 4  ;;  %s1433_s0 = int_to_ptr.hbm [resolvable:$true] %s1432_s0 }
  0x54   :  { %v313_v3 = vsel %vm311_vm0, %v305_v2, 0  ;;  %v2264_v21 = vld [vmem:[#allocation19 + $0x18] sm:$0xff]  ;;  %v2266_v22 = vld [vmem:[#allocation16 + $0x10] sm:$0xff]  ;;  %v2272_v24 = vld [vmem:[#allocation16 + $0x8] sm:$0xff]  ;;  %s1512_s7 = sld [smem:[#allocation3 + $0x3]] }
  0x55   :  { %321 = vmatpush.bf16.msra.mxu0 %v313_v3  ;;  %408 = vmatpush.msra.mxu3 %v380_v10  ;;  %v2270_v23 = vld [vmem:[#allocation19 + $0x10] sm:$0xff]  ;;  %v2274_v25 = vld [vmem:[#allocation19 + $0x8] sm:$0xff]  ;;  %v2278_v26 = vld [vmem:[#allocation16] sm:$0xff]  ;;  %s1525_s25 = sld [smem:[#allocation3 + $0x4]] }
  0x56   :  { %v2280_v27 = vld [vmem:[#allocation19] sm:$0xff]  ;;  %v1546_v28 = vld [vmem:[#allocation10] sm:$0xff]  ;;  %v451_v33 = vld [vmem:[#allocation21 + $0x18] sm:$0xff] }
  0x57   :  { %409 = vmatpush.msra.mxu3 %v379_v18  ;;  %v450_v34 = vld [vmem:[#allocation21 + $0x10] sm:$0xff]  ;;  %v449_v35 = vld [vmem:[#allocation21 + $0x8] sm:$0xff]  ;;  %v448_v36 = vld [vmem:[#allocation21] sm:$0xff] }
  0x58   :  { %v1575_v41 = vld [vmem:[%s2645_s8] ss:$0 sm:$0xff]  ;;  %v2312_v43 = vld [vmem:[#allocation22 + $0x18] sm:$0xff]  ;;  %v2317_v46 = vld [vmem:[#allocation22 + $0x10] sm:$0xff] }
  0x59   :  { %322 = vmatpush.bf16.msra.mxu0 %v1544_v4  ;;  %552 = vmatpush.msrb.mxu3 %v2262_v20  ;;  %v2321_v48 = vld [vmem:[#allocation22 + $0x8] sm:$0xff]  ;;  %v2323_v49 = vld [vmem:[#allocation22] sm:$0xff] }
  0x5a   :  { %v1574_v58 = vld [vmem:[%s2666_s24] ss:$0 sm:$0xff] }
  0x5b   :  { %553 = vmatpush.msrb.mxu3 %v2266_v22 }
  0x5c   :  { %1460 = vmatmul.msk.bf16.vlgmr.msra.gmra.mxu0 %vm307_vm1, %v1543_v5 }
  0x5d   :  { %527 = vmatpush.bf16.msrb.mxu0 %v2062_v8  ;;  %554 = vmatpush.msrb.mxu3 %v2272_v24 }
  0x5f   :  { %555 = vmatpush.msrb.mxu3 %v2278_v26 }
  0x6c   :  { %1482 = vmatmul.msk.bf16.vlgmr.msrb.gmra.mxu0 %vm337_vm2, %v2251_v6 }
  0xd9   :  { %v2255_v11 = vpop.f32.mrf.mxu0 }
  0xe1   :  { %v2257_v12 = vpop.f32.mrf.mxu0 }
  0xe2   :  { %v329_v13 = vpack.c.bf16 %v2257_v12, %v2255_v11 }
  0xe4   :  { %348 = vmatpush.bf16.msra.mxu1 %v329_v13  ;;  %372 = vmatpush.bf16.msra.mxu2 %v329_v13 }
  0xe7   :  { %1465 = vmatmul.msk.bf16.vlgmr.msra.gmra.mxu1 %vm337_vm2, %v1545_v15  ;;  %1470 = vmatmul.msk.bf16.vlgmr.msra.gmra.mxu2 %vm337_vm2, %v1546_v28 }
  0xe8   :  { %437 = vmatpush.msrb.mxu1 %v420_v14  ;;  %474 = vmatpush.msrb.mxu2 %v451_v33  ;;  %v499_v14 = vlaneseq }
  0xe9   :  { %v2295_v31 = vpop.f32.mrf.mxu0 }
  0xea   :  { %438 = vmatpush.msrb.mxu1 %v419_v16  ;;  %475 = vmatpush.msrb.mxu2 %v450_v34  ;;  %v2345_v34 = vshrl.u32 %v499_v14, 7 }
  0xec   :  { %439 = vmatpush.msrb.mxu1 %v418_v17  ;;  %476 = vmatpush.msrb.mxu2 %v449_v35 }
  0xee   :  { %440 = vmatpush.msrb.mxu1 %v417_v19  ;;  %477 = vmatpush.msrb.mxu2 %v448_v36 }
  0xf0   :  { %615 = vmatpush.msra.mxu1 %v2264_v21  ;;  %656 = vmatpush.msra.mxu2 %v2312_v43 }
  0xf1   :  { %v2301_v32 = vpop.f32.mrf.mxu0 }
  0xf2   :  { %616 = vmatpush.msra.mxu1 %v2270_v23  ;;  %657 = vmatpush.msra.mxu2 %v2317_v46 }
  0xf4   :  { %617 = vmatpush.msra.mxu1 %v2274_v25  ;;  %658 = vmatpush.msra.mxu2 %v2321_v48 }
  0xf6   :  { %618 = vmatpush.msra.mxu1 %v2280_v27  ;;  %659 = vmatpush.msra.mxu2 %v2323_v49 }
 0x164   :  { %v350_v29 = vpop.f32.mrf.mxu1 }
 0x165   :  { %1471 = vmatmul.msk.f32.vlgmr.msra.gmra.mxu3 %vm387_vm3, %v350_v29  ;;  %1473 = vmatmul.msk.f32.vlgmr.msrb.gmra.mxu1 %vm387_vm3, %v350_v29 }
 0x166   :  { %773 = vmatpush.msrb.mxu1 %v2262_v20 }
 0x168   :  { %774 = vmatpush.msrb.mxu1 %v2266_v22 }
 0x16a   :  { %775 = vmatpush.msrb.mxu1 %v2272_v24  ;;  %v374_v37 = vpop.f32.mrf.mxu2 }
 0x16b   :  { %1475 = vmatmul.msk.f32.vlgmr.msrb.gmra.mxu2 %vm387_vm3, %v374_v37 }
 0x16c   :  { %v352_v30 = vpop.f32.mrf.mxu1  ;;  %776 = vmatpush.msrb.mxu1 %v2278_v26  ;;  %842 = vmatpush.msrb.mxu2 %v2264_v21 }
 0x16d   :  { %1472 = vmatmul.msk.f32.gmra.mxu3 %vm387_vm3, %v352_v30  ;;  %1474 = vmatmul.msk.f32.gmra.mxu1 %vm387_vm3, %v352_v30 }
 0x16e   :  { %843 = vmatpush.msrb.mxu2 %v2270_v23 }
 0x170   :  { %844 = vmatpush.msrb.mxu2 %v2274_v25 }
 0x172   :  { %v376_v39 = vpop.f32.mrf.mxu2  ;;  %845 = vmatpush.msrb.mxu2 %v2280_v27 }
 0x173   :  { %1476 = vmatmul.msk.f32.gmra.mxu2 %vm387_vm3, %v376_v39 }
 0x175   :  { %1483 = vmatmul.msk.f32.vlgmr.msrb.gmra.mxu3 %vm387_vm3, %v2295_v31  ;;  %1487 = vmatmul.msk.f32.vlgmr.msra.gmra.mxu1 %vm387_vm3, %v2295_v31 }
 0x17d   :  { %1484 = vmatmul.msk.f32.gmra.mxu3 %vm387_vm3, %v2301_v32  ;;  %1488 = vmatmul.msk.f32.gmra.mxu1 %vm387_vm3, %v2301_v32 }
 0x1e2   :  { %v442_v42 = vpop.f32.mrf.mxu1 }
 0x1e3   :  { %v2337_v62 = vadd.f32 %v1574_v58, %v442_v42 }
 0x1e8   :  { %v411_v38 = vpop.f32.mrf.mxu3 }
 0x1e9   :  { %v2314_v44 = vadd.f32 %v1575_v41, %v411_v38  ;;  %v2349_v38 = vadd.s32 8, %v2345_v34 }
 0x1ea   :  { %v445_v51 = vpop.f32.mrf.mxu1 }
 0x1eb   :  { %v2340_v10 = vadd.f32 %v1574_v58, %v445_v51 }
 0x1ee   :  { %v479_v58 = vpop.f32.mrf.mxu2 }
 0x1f0   :  { %v414_v40 = vpop.f32.mrf.mxu3 }
 0x1f1   :  { %v2328_v52 = vadd.f32 %v1575_v41, %v414_v40 }
 0x1f2   :  { %v620_v59 = vpop.f32.mrf.mxu1 }
 0x1f3   :  { %v626_v1 = vadd.f32 %v620_v59, %v2337_v62 }
 0x1f6   :  { %v482_v59 = vpop.f32.mrf.mxu2 }
 0x1f8   :  { %v557_v45 = vpop.f32.mrf.mxu3 }
 0x1f9   :  { %v563_v47 = vadd.f32 %v557_v45, %v2314_v44  ;;  %v504_v45 = vstv %s2342_s5 }
 0x1fa   :  { %v623_v8 = vpop.f32.mrf.mxu1  ;;  %vm506_vm12 = vcmp.ge.s32.totalorder %v2349_v38, %v504_v45  ;;  %vm505_vm14 = vcmp.ge.s32.totalorder %v2345_v34, %v504_v45 }
 0x1fb   :  { %v1485_v50 = vmul.f32 -1.442695, %v563_v47  ;;  %v627_v17 = vadd.f32 %v623_v8, %v2340_v10  ;;  %v2356_v47 = vstv %s1477_s15 }
 0x1fc   :  { %vm509_vm13 = vcmp.lt.s32.totalorder %v2349_v38, %v2356_v47  ;;  %vm508_vm15 = vcmp.lt.s32.totalorder %v2345_v34, %v2356_v47 }
 0x1fd   :  { %1578 = vpow2.f32 %v1485_v50  ;;  %vm2367_vm0 = vmand %vm506_vm12, %vm509_vm13 }
 0x1fe   :  { %vm2374_vm1 = vmand %vm505_vm14, %vm508_vm15 }
 0x200   :  { %v560_v53 = vpop.f32.mrf.mxu3 }
 0x201   :  { %v564_v54 = vadd.f32 %v560_v53, %v2328_v52 }
 0x203   :  { %v1579_v55 = vpop.eup %1578  ;;  %v1486_v56 = vmul.f32 -1.442695, %v564_v54 }
 0x204   :  { %v571_v57 = vadd.f32 1.0, %v1579_v55 }
 0x205   :  { %1580 = vpow2.f32 %v1486_v56 }
 0x206   :  { %1582 = vrcp.f32 %v571_v57  ;;  %v584_v3 = vand.u32 2147483648, %v571_v57  ;;  %v582_v5 = vand.u32 2147483647, %v571_v57  ;;  %vm578_vm5 = vweird.f32 %v571_v57 }
 0x208   :  { %v585_v13 = vor.u32 1.1754944e-38, %v584_v3  ;;  %vm583_vm7 = vcmp.eq.f32.partialorder %v582_v5, 8.507059e+37 }
 0x20b   :  { %v1581_v60 = vpop.eup %1580 }
 0x20c   :  { %v1583_v61 = vpop.eup %1582  ;;  %v572_v63 = vadd.f32 1.0, %v1581_v60  ;;  %v1576_v60 = vld [vmem:[%s2651_s14] ss:$0 sm:$0xff]  ;;  %s1493_s14 = sld [smem:[#allocation3 + $0x2]] }
 0x20d   :  { %v574_v0 = vmul.f32 %v1583_v61, %v571_v57  ;;  %vm579_vm4 = vweird.f32 %v1583_v61 }
 0x20e   :  { %1584 = vrcp.f32 %v572_v63  ;;  %vm580_vm6 = vmor %vm578_vm5, %vm579_vm4  ;;  %v597_v30 = vand.u32 2147483647, %v572_v63  ;;  %v599_v33 = vand.u32 2147483648, %v572_v63  ;;  %vm593_vm9 = vweird.f32 %v572_v63 }
 0x20f   :  { %v575_v2 = vsub.f32 1.0, %v574_v0  ;;  %1586 = vtanh.f32 %v626_v1  ;;  %vm1494_vm4 = vmpackc.low %vm2367_vm0, %vm2374_vm1 }
 0x210   :  { %1588 = vtanh.f32 %v627_v17  ;;  %v600_v41 = vor.u32 1.1754944e-38, %v599_v33  ;;  %vm598_vm11 = vcmp.eq.f32.partialorder %v597_v30, 8.507059e+37 }
 0x211   :  { %v576_v4 = vmul.f32 %v1583_v61, %v575_v2  ;;  %v2408_v2 = vadd.f32 %v1576_v60, %v482_v59 }
 0x213   :  { %v577_v7 = vadd.f32 %v1583_v61, %v576_v4 }
 0x214   :  { %v1585_v9 = vpop.eup %1584 }
 0x215   :  { %v589_v15 = vmul.f32 %v1585_v9, %v572_v63  ;;  %v581_v16 = vsel %vm580_vm6, %v1583_v61, %v577_v7  ;;  %v1587_v29 = vpop.eup %1586  ;;  %vm594_vm8 = vweird.f32 %v1585_v9  ;;  %v2405_v61 = vadd.f32 %v1576_v60, %v479_v58 }
 0x216   :  { %v586_v18 = vsel %vm583_vm7, %v585_v13, %v581_v16  ;;  %vm595_vm10 = vmor %vm593_vm9, %vm594_vm8  ;;  %v1589_v51 = vpop.eup %1588 }
 0x217   :  { %v590_v19 = vsub.f32 1.0, %v589_v15  ;;  %v630_v28 = vsub.f32 1.0, %v586_v18  ;;  %v634_v37 = vmul.f32 %v1587_v29, %v586_v18 }
 0x219   :  { %v591_v35 = vmul.f32 %v1585_v9, %v590_v19  ;;  %v632_v36 = vmul.f32 %v630_v28, %v2295_v31 }
 0x21b   :  { %v2351_v39 = vadd.f32 %v634_v37, %v632_v36  ;;  %v592_v40 = vadd.f32 %v1585_v9, %v591_v35 }
 0x21d   :  { %1489 = vmatmul.msk.f32.vlgmr.msra.gmra.mxu2 %vm387_vm3, %v2351_v39  ;;  %v596_v42 = vsel %vm595_vm10, %v1585_v9, %v592_v40 }
 0x21e   :  { %v601_v31 = vsel %vm598_vm11, %v600_v41, %v596_v42  ;;  %1000 = vmatpush.msra.mxu2 %v2262_v20 }
 0x21f   :  { %v631_v50 = vsub.f32 1.0, %v601_v31  ;;  %v635_v54 = vmul.f32 %v1589_v51, %v601_v31 }
 0x220   :  { %1001 = vmatpush.msra.mxu2 %v2266_v22 }
 0x221   :  { %v633_v53 = vmul.f32 %v631_v50, %v2301_v32 }
 0x222   :  { %1002 = vmatpush.msra.mxu2 %v2272_v24 }
 0x223   :  { %v2372_v56 = vadd.f32 %v635_v54, %v633_v53 }
 0x224   :  { %1003 = vmatpush.msra.mxu2 %v2278_v26 }
 0x225   :  { %1490 = vmatmul.msk.f32.gmra.mxu2 %vm387_vm3, %v2372_v56  ;;  %v1495_v32 = vpack.c.bf16 %v2372_v56, %v2351_v39 }
 0x227   :  { %1496 = vmatpush.bf16.msk.msra.mxu0 %vm1494_vm4, %v1495_v32 }
 0x22a   :  { %1497 = vmatmul.msk.bf16.vlgmr.msra.gmra.mxu0 %vm337_vm2, %v2251_v6 }
 0x22b   :  { %883 = vmatpush.msrb.mxu0 %v2312_v43 }
 0x22d   :  { %884 = vmatpush.msrb.mxu0 %v2317_v46 }
 0x22f   :  { %885 = vmatpush.msrb.mxu0 %v2321_v48 }
 0x231   :  { %886 = vmatpush.msrb.mxu0 %v2323_v49 }
 0x233   :  { %1069 = vmatpush.msra.mxu0 %v2264_v21 }
 0x235   :  { %1070 = vmatpush.msra.mxu0 %v2270_v23 }
 0x237   :  { %1071 = vmatpush.msra.mxu0 %v2274_v25 }
 0x239   :  { %1072 = vmatpush.msra.mxu0 %v2280_v27 }
 0x2a0   :  { %v661_v63 = vpop.f32.mrf.mxu2 }
 0x2a1   :  { %v667_v0 = vadd.f32 %v661_v63, %v2405_v61 }
 0x2a3   :  { %v1491_v1 = vmul.f32 -1.442695, %v667_v0 }
 0x2a5   :  { %1590 = vpow2.f32 %v1491_v1 }
 0x2a7   :  { %v2410_v3 = vpop.f32.mrf.mxu0 }
 0x2a8   :  { %v664_v4 = vpop.f32.mrf.mxu2  ;;  %1502 = vmatmul.msk.f32.vlgmr.msrb.gmra.mxu1 %vm387_vm3, %v2410_v3 }
 0x2a9   :  { %v668_v5 = vadd.f32 %v664_v4, %v2408_v2 }
 0x2ab   :  { %v1591_v7 = vpop.eup %1590  ;;  %v1492_v8 = vmul.f32 -1.442695, %v668_v5 }
 0x2ac   :  { %v675_v9 = vadd.f32 1.0, %v1591_v7 }
 0x2ad   :  { %1592 = vpow2.f32 %v1492_v8 }
 0x2ae   :  { %1594 = vrcp.f32 %v675_v9  ;;  %v688_v33 = vand.u32 2147483648, %v675_v9  ;;  %vm682_vm6 = vweird.f32 %v675_v9  ;;  %v686_v35 = vand.u32 2147483647, %v675_v9 }
 0x2af   :  { %v2415_v13 = vpop.f32.mrf.mxu0 }
 0x2b0   :  { %1503 = vmatmul.msk.f32.gmra.mxu1 %vm387_vm3, %v2415_v13  ;;  %v689_v45 = vor.u32 1.1754944e-38, %v688_v33  ;;  %vm687_vm9 = vcmp.eq.f32.partialorder %v686_v35, 8.507059e+37 }
 0x2b3   :  { %v1593_v14 = vpop.eup %1592 }
 0x2b4   :  { %v1595_v15 = vpop.eup %1594  ;;  %v676_v16 = vadd.f32 1.0, %v1593_v14 }
 0x2b5   :  { %v678_v17 = vmul.f32 %v1595_v15, %v675_v9  ;;  %vm683_vm5 = vweird.f32 %v1595_v15 }
 0x2b6   :  { %1596 = vrcp.f32 %v676_v16  ;;  %vm684_vm7 = vmor %vm682_vm6, %vm683_vm5  ;;  %v703_v37 = vand.u32 2147483648, %v676_v16  ;;  %v701_v41 = vand.u32 2147483647, %v676_v16  ;;  %vm697_vm10 = vweird.f32 %v676_v16 }
 0x2b7   :  { %v679_v18 = vsub.f32 1.0, %v678_v17 }
 0x2b8   :  { %v704_v50 = vor.u32 1.1754944e-38, %v703_v37  ;;  %vm702_vm12 = vcmp.eq.f32.partialorder %v701_v41, 8.507059e+37 }
 0x2b9   :  { %v680_v19 = vmul.f32 %v1595_v15, %v679_v18 }
 0x2bb   :  { %v681_v29 = vadd.f32 %v1595_v15, %v680_v19 }
 0x2bc   :  { %v1597_v28 = vpop.eup %1596 }
 0x2bd   :  { %v693_v30 = vmul.f32 %v1597_v28, %v676_v16  ;;  %vm698_vm8 = vweird.f32 %v1597_v28  ;;  %v685_v42 = vsel %vm684_vm7, %v1595_v15, %v681_v29 }
 0x2be   :  { %vm699_vm11 = vmor %vm697_vm10, %vm698_vm8  ;;  %v690_v51 = vsel %vm687_vm9, %v689_v45, %v685_v42  ;;  %vm718_vm9 = vcmp.ge.s32.totalorder %v2345_v34, %v2356_v47 }
 0x2bf   :  { %v694_v36 = vsub.f32 1.0, %v693_v30  ;;  %v2420_v32 = vmul.f32 %v690_v51, %v2351_v39 }
 0x2c1   :  { %v695_v40 = vmul.f32 %v1597_v28, %v694_v36 }
 0x2c3   :  { %v696_v31 = vadd.f32 %v1597_v28, %v695_v40 }
 0x2c5   :  { %v700_v53 = vsel %vm699_vm11, %v1597_v28, %v696_v31  ;;  %vm719_vm11 = vcmp.ge.s32.totalorder %v2349_v38, %v2356_v47  ;;  %v713_v47 = vsel %vm2374_vm1, %v2351_v39, 0.0 }
 0x2c6   :  { %v705_v54 = vsel %vm702_vm12, %v704_v50, %v700_v53 }
 0x2c7   :  { %v2423_v58 = vmul.f32 %v705_v54, %v2372_v56 }
 0x2c9   :  { %v1499_v59 = vpack.c.bf16 %v2423_v58, %v2420_v32 }
 0x2cb   :  { %1500 = vmatpush.bf16.msk.msra.mxu3 %vm1494_vm4, %v1499_v59 }
 0x2ce   :  { %1501 = vmatmul.msk.bf16.vlgmr.msra.gmra.mxu3 %vm337_vm2, %v2251_v6 }
 0x2cf   :  { %1549 = vmatpush.msrb.mxu3 %v2312_v43 }
 0x2d1   :  { %1550 = vmatpush.msrb.mxu3 %v2317_v46 }
 0x2d3   :  { %1551 = vmatpush.msrb.mxu3 %v2321_v48 }
 0x2d5   :  { %1552 = vmatpush.msrb.mxu3 %v2323_v49 }
 0x325   :  { %v778_v0 = vpop.f32.mrf.mxu1 }
 0x326   :  { %v784_v1 = vadd.f32 %v778_v0, %v2314_v44 }
 0x328   :  { %v1504_v4 = vmul.f32 -1.442695, %v784_v1 }
 0x32a   :  { %1598 = vpow2.f32 %v1504_v4 }
 0x32d   :  { %v781_v5 = vpop.f32.mrf.mxu1 }
 0x32e   :  { %v785_v7 = vadd.f32 %v781_v5, %v2328_v52 }
 0x330   :  { %v1505_v8 = vmul.f32 -1.442695, %v785_v7  ;;  %v1599_v9 = vpop.eup %1598 }
 0x331   :  { %v792_v14 = vadd.f32 1.0, %v1599_v9 }
 0x332   :  { %1600 = vpow2.f32 %v1505_v8 }
 0x333   :  { %1602 = vrcp.f32 %v792_v14  ;;  %v805_v36 = vand.u32 2147483648, %v792_v14  ;;  %vm799_vm14 = vweird.f32 %v792_v14  ;;  %v803_v37 = vand.u32 2147483647, %v792_v14 }
 0x335   :  { %v806_v45 = vor.u32 1.1754944e-38, %v805_v36  ;;  %vm804_vm4 = vcmp.eq.f32.partialorder %v803_v37, 8.507059e+37 }
 0x338   :  { %v1601_v15 = vpop.eup %1600 }
 0x339   :  { %v793_v16 = vadd.f32 1.0, %v1601_v15  ;;  %v1603_v17 = vpop.eup %1602 }
 0x33a   :  { %v795_v18 = vmul.f32 %v1603_v17, %v792_v14  ;;  %vm800_vm13 = vweird.f32 %v1603_v17  ;;  %v2447_v14 = vstv %s1493_s14 }
 0x33b   :  { %1604 = vrcp.f32 %v793_v16  ;;  %vm801_vm15 = vmor %vm799_vm14, %vm800_vm13  ;;  %v820_v53 = vand.u32 2147483648, %v793_v16  ;;  %vm814_vm6 = vweird.f32 %v793_v16  ;;  %v818_v59 = vand.u32 2147483647, %v793_v16 }
 0x33c   :  { %v796_v19 = vsub.f32 1.0, %v795_v18  ;;  %vm721_vm10 = vcmp.lt.s32.totalorder %v2345_v34, %v2447_v14  ;;  %vm722_vm12 = vcmp.lt.s32.totalorder %v2349_v38, %v2447_v14 }
 0x33d   :  { %v821_v1 = vor.u32 1.1754944e-38, %v820_v53  ;;  %vm819_vm8 = vcmp.eq.f32.partialorder %v818_v59, 8.507059e+37  ;;  %vm2462_vm13 = vmand %vm718_vm9, %vm721_vm10 }
 0x33e   :  { %v797_v30 = vmul.f32 %v1603_v17, %v796_v19  ;;  %vm2466_vm14 = vmand %vm719_vm11, %vm722_vm12 }
 0x340   :  { %v798_v35 = vadd.f32 %v1603_v17, %v797_v30 }
 0x341   :  { %v1605_v28 = vpop.eup %1604 }
 0x342   :  { %v810_v29 = vmul.f32 %v1605_v28, %v793_v16  ;;  %v802_v40 = vsel %vm801_vm15, %v1603_v17, %v798_v35  ;;  %vm815_vm5 = vweird.f32 %v1605_v28 }
 0x343   :  { %v807_v50 = vsel %vm804_vm4, %v806_v45, %v802_v40  ;;  %vm816_vm7 = vmor %vm814_vm6, %vm815_vm5 }
 0x344   :  { %v811_v33 = vsub.f32 1.0, %v810_v29  ;;  %v857_v54 = vsub.f32 1.0, %v807_v50 }
 0x346   :  { %v812_v42 = vmul.f32 %v1605_v28, %v811_v33  ;;  %v859_v5 = vmul.f32 %v857_v54, %v2410_v3 }
 0x348   :  { %v813_v51 = vadd.f32 %v1605_v28, %v812_v42 }
 0x351   :  { %v750_v60 = vpop.f32.mrf.mxu3 }
 0x352   :  { %1506 = vmatmul.msk.f32.vlgmr.msrb.gmra.mxu2 %vm387_vm3, %v750_v60  ;;  %v817_v60 = vsel %vm816_vm7, %v1605_v28, %v813_v51 }
 0x353   :  { %v822_v8 = vsel %vm819_vm8, %v821_v1, %v817_v60 }
 0x354   :  { %v858_v15 = vsub.f32 1.0, %v822_v8 }
 0x356   :  { %v860_v16 = vmul.f32 %v858_v15, %v2415_v13  ;;  %v716_v15 = vsel %vm2367_vm0, %v2423_v58, 0.0 }
 0x359   :  { %v752_v63 = vpop.f32.mrf.mxu3 }
 0x35a   :  { %1507 = vmatmul.msk.f32.gmra.mxu2 %vm387_vm3, %v752_v63 }
 0x3d5   :  { %v847_v41 = vpop.f32.mrf.mxu2 }
 0x3d6   :  { %v853_v31 = vadd.f32 %v847_v41, %v2337_v62 }
 0x3d8   :  { %1606 = vtanh.f32 %v853_v31 }
 0x3dd   :  { %v850_v63 = vpop.f32.mrf.mxu2 }
 0x3de   :  { %v1607_v0 = vpop.eup %1606  ;;  %v854_v4 = vadd.f32 %v850_v63, %v2340_v10 }
 0x3df   :  { %v861_v7 = vmul.f32 %v1607_v0, %v807_v50 }
 0x3e0   :  { %1608 = vtanh.f32 %v854_v4 }
 0x3e1   :  { %v2445_v9 = vadd.f32 %v861_v7, %v859_v5 }
 0x3e3   :  { %1508 = vmatmul.msk.f32.vlgmr.msrb.gmra.mxu0 %vm387_vm3, %v2445_v9  ;;  %v2485_v13 = vsel %vm2462_vm13, %v2445_v9, %v713_v47 }
 0x3e4   :  { %1227 = vmatpush.msrb.mxu0 %v2262_v20 }
 0x3e6   :  { %v1609_v3 = vpop.eup %1608  ;;  %1228 = vmatpush.msrb.mxu0 %v2266_v22  ;;  %v714_v22 = vsel %vm2367_vm0, %v2372_v56, 0.0 }
 0x3e7   :  { %v862_v17 = vmul.f32 %v1609_v3, %v822_v8  ;;  %v715_v8 = vsel %vm2374_vm1, %v2420_v32, 0.0 }
 0x3e8   :  { %1229 = vmatpush.msrb.mxu0 %v2272_v24 }
 0x3e9   :  { %v2471_v20 = vadd.f32 %v862_v17, %v860_v16 }
 0x3ea   :  { %1230 = vmatpush.msrb.mxu0 %v2278_v26 }
 0x3eb   :  { %1509 = vmatmul.msk.f32.vlgmr.msrb.gmra.mxu3 %vm387_vm3, %v2471_v20  ;;  %v2490_v24 = vsel %vm2466_vm14, %v2471_v20, %v714_v22 }
 0x3ec   :  { %v952_v39 = vpack.c.bf16 %v2490_v24, %v2485_v13 }
 0x3ee   :  { %960 = vmatpush.bf16.msra.mxu3 %v952_v39 }
 0x3f2   :  { %1110 = vmatpush.msrb.mxu3 %v2312_v43 }
 0x3f3   :  { %1513 = vmatmul.msk.bf16.vlgmr.msra.gmra.mxu3 %vm337_vm2, %v2251_v6 }
 0x3f4   :  { %1111 = vmatpush.msrb.mxu3 %v2317_v46 }
 0x3f6   :  { %1112 = vmatpush.msrb.mxu3 %v2321_v48 }
 0x3f8   :  { %1113 = vmatpush.msrb.mxu3 %v2323_v49 }
 0x3fa   :  { %1296 = vmatpush.msra.mxu3 %v2264_v21 }
 0x3fc   :  { %1297 = vmatpush.msra.mxu3 %v2270_v23 }
 0x3fe   :  { %1298 = vmatpush.msra.mxu3 %v2274_v25 }
 0x400   :  { %1299 = vmatpush.msra.mxu3 %v2280_v27 }
 0x460   :  { %v888_v26 = vpop.f32.mrf.mxu0 }
 0x461   :  { %v894_v43 = vadd.f32 %v888_v26, %v2405_v61 }
 0x463   :  { %v1510_v56 = vmul.f32 -1.442695, %v894_v43 }
 0x465   :  { %1610 = vpow2.f32 %v1510_v56 }
 0x46b   :  { %v1611_v46 = vpop.eup %1610 }
 0x46c   :  { %v902_v28 = vadd.f32 1.0, %v1611_v46 }
 0x46e   :  { %1612 = vrcp.f32 %v902_v28  ;;  %v891_v29 = vpop.f32.mrf.mxu3  ;;  %v915_v41 = vand.u32 2147483648, %v902_v28  ;;  %vm909_vm4 = vweird.f32 %v902_v28  ;;  %v913_v42 = vand.u32 2147483647, %v902_v28 }
 0x46f   :  { %v895_v48 = vadd.f32 %v891_v29, %v2408_v2 }
 0x470   :  { %v916_v51 = vor.u32 1.1754944e-38, %v915_v41  ;;  %vm914_vm7 = vcmp.eq.f32.partialorder %v913_v42, 8.507059e+37 }
 0x471   :  { %v1511_v49 = vmul.f32 -1.442695, %v895_v48 }
 0x473   :  { %1614 = vpow2.f32 %v1511_v49 }
 0x474   :  { %v1613_v21 = vpop.eup %1612 }
 0x475   :  { %v905_v30 = vmul.f32 %v1613_v21, %v902_v28  ;;  %vm910_vm15 = vweird.f32 %v1613_v21 }
 0x476   :  { %v2506_v23 = vpop.f32.mrf.mxu3  ;;  %vm911_vm5 = vmor %vm909_vm4, %vm910_vm15 }
 0x477   :  { %1515 = vmatmul.msk.f32.vlgmr.msra.gmra.mxu2 %vm387_vm3, %v2506_v23  ;;  %v906_v27 = vsub.f32 1.0, %v905_v30 }
 0x479   :  { %v1615_v25 = vpop.eup %1614  ;;  %v907_v35 = vmul.f32 %v1613_v21, %v906_v27 }
 0x47a   :  { %v903_v33 = vadd.f32 1.0, %v1615_v25 }
 0x47b   :  { %v908_v37 = vadd.f32 %v1613_v21, %v907_v35 }
 0x47c   :  { %1616 = vrcp.f32 %v903_v33  ;;  %v930_v53 = vand.u32 2147483648, %v903_v33  ;;  %v928_v59 = vand.u32 2147483647, %v903_v33  ;;  %vm924_vm8 = vweird.f32 %v903_v33 }
 0x47d   :  { %v912_v50 = vsel %vm911_vm5, %v1613_v21, %v908_v37  ;;  %vm945_vm5 = vcmp.ge.s32.totalorder %v2345_v34, %v2447_v14 }
 0x47e   :  { %v2510_v36 = vpop.f32.mrf.mxu3  ;;  %v917_v60 = vsel %vm914_vm7, %v916_v51, %v912_v50  ;;  %v931_v0 = vor.u32 1.1754944e-38, %v930_v53  ;;  %vm929_vm10 = vcmp.eq.f32.partialorder %v928_v59, 8.507059e+37  ;;  %vm946_vm7 = vcmp.ge.s32.totalorder %v2349_v38, %v2447_v14 }
 0x47f   :  { %1516 = vmatmul.msk.f32.gmra.mxu2 %vm387_vm3, %v2510_v36  ;;  %v934_v4 = vmul.f32 %v917_v60, %v2445_v9 }
 0x481   :  { %v2524_v3 = vsel %vm2462_vm13, %v934_v4, %v715_v8 }
 0x482   :  { %v1617_v40 = vpop.eup %1616 }
 0x483   :  { %v920_v45 = vmul.f32 %v1617_v40, %v903_v33  ;;  %vm925_vm6 = vweird.f32 %v1617_v40 }
 0x484   :  { %vm926_vm9 = vmor %vm924_vm8, %vm925_vm6 }
 0x485   :  { %v921_v31 = vsub.f32 1.0, %v920_v45 }
 0x487   :  { %v922_v54 = vmul.f32 %v1617_v40, %v921_v31 }
 0x489   :  { %v923_v63 = vadd.f32 %v1617_v40, %v922_v54 }
 0x48b   :  { %v927_v1 = vsel %vm926_vm9, %v1617_v40, %v923_v63 }
 0x48c   :  { %v932_v5 = vsel %vm929_vm10, %v931_v0, %v927_v1 }
 0x48d   :  { %v935_v7 = vmul.f32 %v932_v5, %v2471_v20  ;;  %v2543_v5 = vstv %s1512_s7 }
 0x48e   :  { %vm948_vm6 = vcmp.lt.s32.totalorder %v2345_v34, %v2543_v5  ;;  %vm949_vm8 = vcmp.lt.s32.totalorder %v2349_v38, %v2543_v5 }
 0x48f   :  { %v2528_v16 = vsel %vm2466_vm14, %v935_v7, %v716_v15  ;;  %vm2556_vm9 = vmand %vm945_vm5, %vm948_vm6 }
 0x490   :  { %v967_v9 = vpack.c.bf16 %v2528_v16, %v2524_v3  ;;  %vm2560_vm10 = vmand %vm946_vm7, %vm949_vm8 }
 0x492   :  { %975 = vmatpush.bf16.msra.mxu1 %v967_v9 }
 0x495   :  { %1514 = vmatmul.msk.bf16.vlgmr.msra.gmra.mxu1 %vm337_vm2, %v2251_v6 }
 0x4fa   :  { %v1005_v32 = vpop.f32.mrf.mxu2 }
 0x4fb   :  { %v1011_v58 = vadd.f32 %v1005_v32, %v2314_v44 }
 0x4fd   :  { %v1517_v17 = vmul.f32 -1.442695, %v1011_v58  ;;  %v1353_v58 = vld [vmem:[#allocation24 + $0x18] sm:$0xff] }
 0x4ff   :  { %1618 = vpow2.f32 %v1517_v17  ;;  %v1352_v17 = vld [vmem:[#allocation24 + $0x10] sm:$0xff] }
 0x502   :  { %v1008_v18 = vpop.f32.mrf.mxu2 }
 0x503   :  { %v1012_v19 = vadd.f32 %v1008_v18, %v2328_v52  ;;  %v1351_v18 = vld [vmem:[#allocation24 + $0x8] sm:$0xff] }
 0x505   :  { %v1518_v20 = vmul.f32 -1.442695, %v1012_v19  ;;  %v1619_v47 = vpop.eup %1618 }
 0x506   :  { %v1019_v22 = vadd.f32 1.0, %v1619_v47 }
 0x507   :  { %1620 = vpow2.f32 %v1518_v20 }
 0x508   :  { %1622 = vrcp.f32 %v1019_v22  ;;  %v1032_v30 = vand.u32 2147483648, %v1019_v22  ;;  %vm1026_vm1 = vweird.f32 %v1019_v22  ;;  %v1030_v25 = vand.u32 2147483647, %v1019_v22 }
 0x50a   :  { %v1033_v37 = vor.u32 1.1754944e-38, %v1032_v30  ;;  %vm1031_vm12 = vcmp.eq.f32.partialorder %v1030_v25, 8.507059e+37 }
 0x50d   :  { %v1621_v39 = vpop.eup %1620 }
 0x50e   :  { %v1020_v26 = vadd.f32 1.0, %v1621_v39  ;;  %v1623_v43 = vpop.eup %1622 }
 0x50f   :  { %v1022_v56 = vmul.f32 %v1623_v43, %v1019_v22  ;;  %vm1027_vm0 = vweird.f32 %v1623_v43 }
 0x510   :  { %1624 = vrcp.f32 %v1020_v26  ;;  %vm1028_vm11 = vmor %vm1026_vm1, %vm1027_vm0  ;;  %v1047_v45 = vand.u32 2147483648, %v1020_v26  ;;  %vm1041_vm14 = vweird.f32 %v1020_v26  ;;  %v1045_v50 = vand.u32 2147483647, %v1020_v26 }
 0x511   :  { %v1023_v46 = vsub.f32 1.0, %v1022_v56 }
 0x512   :  { %v977_v57 = vpop.f32.mrf.mxu1  ;;  %v1048_v60 = vor.u32 1.1754944e-38, %v1047_v45  ;;  %vm1046_vm4 = vcmp.eq.f32.partialorder %v1045_v50, 8.507059e+37 }
 0x513   :  { %1519 = vmatmul.msk.f32.vlgmr.msra.gmra.mxu0 %vm387_vm3, %v977_v57  ;;  %v1024_v48 = vmul.f32 %v1623_v43, %v1023_v46 }
 0x514   :  { %1405 = vmatpush.msra.mxu0 %v1353_v58 }
 0x515   :  { %v1025_v21 = vadd.f32 %v1623_v43, %v1024_v48 }
 0x516   :  { %v1625_v28 = vpop.eup %1624  ;;  %1406 = vmatpush.msra.mxu0 %v1352_v17 }
 0x517   :  { %v1037_v29 = vmul.f32 %v1625_v28, %v1020_v26  ;;  %v1029_v27 = vsel %vm1028_vm11, %v1623_v43, %v1025_v21  ;;  %vm1042_vm13 = vweird.f32 %v1625_v28 }
 0x518   :  { %v1034_v41 = vsel %vm1031_vm12, %v1033_v37, %v1029_v27  ;;  %vm1043_vm15 = vmor %vm1041_vm14, %vm1042_vm13  ;;  %1407 = vmatpush.msra.mxu0 %v1351_v18 }
 0x519   :  { %v1038_v49 = vsub.f32 1.0, %v1037_v29  ;;  %v1084_v31 = vsub.f32 1.0, %v1034_v41 }
 0x51a   :  { %v979_v55 = vpop.f32.mrf.mxu1 }
 0x51b   :  { %1520 = vmatmul.msk.f32.gmra.mxu0 %vm387_vm3, %v979_v55  ;;  %v1039_v35 = vmul.f32 %v1625_v28, %v1038_v49  ;;  %v1086_v63 = vmul.f32 %v1084_v31, %v2506_v23 }
 0x51d   :  { %v1040_v42 = vadd.f32 %v1625_v28, %v1039_v35 }
 0x51f   :  { %v1044_v53 = vsel %vm1043_vm15, %v1625_v28, %v1040_v42 }
 0x520   :  { %v1049_v1 = vsel %vm1046_vm4, %v1048_v60, %v1044_v53 }
 0x521   :  { %v1085_v7 = vsub.f32 1.0, %v1049_v1 }
 0x523   :  { %v1087_v8 = vmul.f32 %v1085_v7, %v2510_v36 }
 0x590   :  { %v1074_v33 = vpop.f32.mrf.mxu0 }
 0x591   :  { %v1080_v40 = vadd.f32 %v1074_v33, %v2337_v62 }
 0x593   :  { %1626 = vtanh.f32 %v1080_v40 }
 0x598   :  { %v1077_v51 = vpop.f32.mrf.mxu0 }
 0x599   :  { %v1627_v54 = vpop.eup %1626  ;;  %v1081_v59 = vadd.f32 %v1077_v51, %v2340_v10 }
 0x59a   :  { %v1088_v0 = vmul.f32 %v1627_v54, %v1034_v41 }
 0x59b   :  { %1628 = vtanh.f32 %v1081_v59 }
 0x59c   :  { %v2541_v4 = vadd.f32 %v1088_v0, %v1086_v63  ;;  %v1650_v63 = vld [vmem:[#allocation12] sm:$0xff] }
 0x59e   :  { %1521 = vmatmul.msk.f32.vlgmr.msrb.gmra.mxu3 %vm387_vm3, %v2541_v4  ;;  %v2572_v14 = vsel %vm2556_vm9, %v2541_v4, %v2485_v13  ;;  %v1350_v13 = vld [vmem:[#allocation24] sm:$0xff] }
 0x59f   :  { %1408 = vmatpush.msra.mxu0 %v1350_v13 }
 0x5a1   :  { %v1629_v23 = vpop.eup %1628 }
 0x5a2   :  { %v1089_v15 = vmul.f32 %v1629_v23, %v1049_v1 }
 0x5a4   :  { %v2564_v55 = vadd.f32 %v1089_v15, %v1087_v8 }
 0x5a6   :  { %1522 = vmatmul.msk.f32.gmra.mxu3 %vm387_vm3, %v2564_v55  ;;  %v2578_v36 = vsel %vm2560_vm10, %v2564_v55, %v2490_v24 }
 0x5a7   :  { %v1179_v32 = vpack.c.bf16 %v2578_v36, %v2572_v14 }
 0x5a9   :  { %1187 = vmatpush.bf16.msrb.mxu1 %v1179_v32 }
 0x5ac   :  { %1526 = vmatmul.msk.bf16.vlgmr.msrb.gmra.mxu1 %vm337_vm2, %v2251_v6 }
 0x621   :  { %v1115_v19 = vpop.f32.mrf.mxu3 }
 0x622   :  { %v1121_v20 = vadd.f32 %v1115_v19, %v2405_v61 }
 0x624   :  { %v1523_v24 = vmul.f32 -1.442695, %v1121_v20  ;;  %v1357_v20 = vld [vmem:[#allocation25 + $0x18] sm:$0xff] }
 0x626   :  { %1630 = vpow2.f32 %v1523_v24  ;;  %v1355_v24 = vld [vmem:[#allocation25 + $0x8] sm:$0xff] }
 0x629   :  { %v1118_v47 = vpop.f32.mrf.mxu3  ;;  %v2585_v22 = vpop.f32.mrf.mxu1 }
 0x62a   :  { %v1122_v39 = vadd.f32 %v1118_v47, %v2408_v2  ;;  %1528 = vmatmul.msk.f32.vlgmr.msrb.gmra.mxu0 %vm387_vm3, %v2585_v22 }
 0x62c   :  { %v1631_v6 = vpop.eup %1630  ;;  %v1524_v26 = vmul.f32 -1.442695, %v1122_v39 }
 0x62d   :  { %v1129_v43 = vadd.f32 1.0, %v1631_v6 }
 0x62e   :  { %1632 = vpow2.f32 %v1524_v26 }
 0x62f   :  { %1634 = vrcp.f32 %v1129_v43  ;;  %v1142_v30 = vand.u32 2147483648, %v1129_v43  ;;  %vm1136_vm1 = vweird.f32 %v1129_v43  ;;  %v1140_v25 = vand.u32 2147483647, %v1129_v43 }
 0x631   :  { %v2590_v56 = vpop.f32.mrf.mxu1  ;;  %v1143_v37 = vor.u32 1.1754944e-38, %v1142_v30  ;;  %vm1141_vm13 = vcmp.eq.f32.partialorder %v1140_v25, 8.507059e+37 }
 0x632   :  { %1529 = vmatmul.msk.f32.gmra.mxu0 %vm387_vm3, %v2590_v56 }
 0x634   :  { %v1633_v61 = vpop.eup %1632 }
 0x635   :  { %v1635_v46 = vpop.eup %1634  ;;  %v1130_v28 = vadd.f32 1.0, %v1633_v61 }
 0x636   :  { %v1132_v29 = vmul.f32 %v1635_v46, %v1129_v43  ;;  %vm1137_vm0 = vweird.f32 %v1635_v46 }
 0x637   :  { %1636 = vrcp.f32 %v1130_v28  ;;  %vm1138_vm11 = vmor %vm1136_vm1, %vm1137_vm0  ;;  %v1157_v40 = vand.u32 2147483648, %v1130_v28  ;;  %v1155_v42 = vand.u32 2147483647, %v1130_v28  ;;  %vm1151_vm14 = vweird.f32 %v1130_v28 }
 0x638   :  { %v1133_v48 = vsub.f32 1.0, %v1132_v29 }
 0x639   :  { %v1158_v31 = vor.u32 1.1754944e-38, %v1157_v40  ;;  %vm1156_vm4 = vcmp.eq.f32.partialorder %v1155_v42, 8.507059e+37 }
 0x63a   :  { %v1134_v2 = vmul.f32 %v1635_v46, %v1133_v48  ;;  %1541 = vmatmul.msk.f32.vlgmr.msra.gmra.mxu0 %vm387_vm3, %v2255_v11 }
 0x63c   :  { %v1135_v49 = vadd.f32 %v1635_v46, %v1134_v2 }
 0x63d   :  { %v1637_v21 = vpop.eup %1636 }
 0x63e   :  { %v1147_v27 = vmul.f32 %v1637_v21, %v1130_v28  ;;  %v1139_v35 = vsel %vm1138_vm11, %v1635_v46, %v1135_v49  ;;  %vm1152_vm12 = vweird.f32 %v1637_v21  ;;  %vm1172_vm11 = vcmp.ge.s32.totalorder %v2345_v34, %v2543_v5 }
 0x63f   :  { %v1144_v11 = vsel %vm1141_vm13, %v1143_v37, %v1139_v35  ;;  %vm1153_vm15 = vmor %vm1151_vm14, %vm1152_vm12  ;;  %v1174_v37 = vstv %s1525_s25  ;;  %vm1173_vm13 = vcmp.ge.s32.totalorder %v2349_v38, %v2543_v5  ;;  %v1354_v5 = vld [vmem:[#allocation25] sm:$0xff] }
 0x640   :  { %v1148_v33 = vsub.f32 1.0, %v1147_v27  ;;  %v1161_v51 = vmul.f32 %v1144_v11, %v2541_v4  ;;  %vm1175_vm12 = vcmp.lt.s32.totalorder %v2345_v34, %v1174_v37  ;;  %vm1176_vm14 = vcmp.lt.s32.totalorder %v2349_v38, %v1174_v37 }
 0x642   :  { %v1149_v41 = vmul.f32 %v1637_v21, %v1148_v33  ;;  %1542 = vmatmul.msk.f32.gmra.mxu0 %vm387_vm3, %v2257_v12  ;;  %v1169_v59 = vsel %vm2556_vm9, %v1161_v51, %v2524_v3 }
 0x644   :  { %v1150_v45 = vadd.f32 %v1637_v21, %v1149_v41 }
 0x646   :  { %v1154_v50 = vsel %vm1153_vm15, %v1637_v21, %v1150_v45  ;;  %vm1177_vm15 = vmand %vm1172_vm11, %vm1175_vm12 }
 0x647   :  { %v1159_v53 = vsel %vm1156_vm4, %v1158_v31, %v1154_v50  ;;  %vm1178_vm4 = vmand %vm1173_vm13, %vm1176_vm14 }
 0x648   :  { %v1162_v54 = vmul.f32 %v1159_v53, %v2564_v55 }
 0x64a   :  { %v1170_v12 = vsel %vm2560_vm10, %v1162_v54, %v2528_v16  ;;  %v1548_v54 = vld [vmem:[#allocation13] sm:$0xff] }
 0x64b   :  { %v1194_v60 = vpack.c.bf16 %v1170_v12, %v1169_v59 }
 0x64d   :  { %1202 = vmatpush.bf16.msrb.mxu2 %v1194_v60 }
 0x650   :  { %1527 = vmatmul.msk.bf16.vlgmr.msrb.gmra.mxu2 %vm337_vm2, %v1650_v63 }
 0x651   :  { %1376 = vmatpush.msra.mxu2 %v1357_v20 }
 0x6a7   :  { %v1232_v4 = vpop.f32.mrf.mxu0 }
 0x6a8   :  { %v1238_v23 = vadd.f32 %v1232_v4, %v2314_v44  ;;  %v1356_v44 = vld [vmem:[#allocation25 + $0x10] sm:$0xff] }
 0x6a9   :  { %1377 = vmatpush.msra.mxu2 %v1356_v44 }
 0x6aa   :  { %v1530_v8 = vmul.f32 -1.442695, %v1238_v23 }
 0x6ab   :  { %1378 = vmatpush.msra.mxu2 %v1355_v24 }
 0x6ac   :  { %1638 = vpow2.f32 %v1530_v8 }
 0x6ad   :  { %1379 = vmatpush.msra.mxu2 %v1354_v5 }
 0x6af   :  { %v1235_v7 = vpop.f32.mrf.mxu0 }
 0x6b0   :  { %v1239_v3 = vadd.f32 %v1235_v7, %v2328_v52 }
 0x6b2   :  { %v1531_v15 = vmul.f32 -1.442695, %v1239_v3  ;;  %v1639_v16 = vpop.eup %1638 }
 0x6b3   :  { %v1246_v57 = vadd.f32 1.0, %v1639_v16 }
 0x6b4   :  { %1640 = vpow2.f32 %v1531_v15 }
 0x6b5   :  { %1642 = vrcp.f32 %v1246_v57  ;;  %v1259_v43 = vand.u32 2147483648, %v1246_v57  ;;  %vm1253_vm6 = vweird.f32 %v1246_v57  ;;  %v1257_v61 = vand.u32 2147483647, %v1246_v57 }
 0x6b7   :  { %v1260_v2 = vor.u32 1.1754944e-38, %v1259_v43  ;;  %vm1258_vm0 = vcmp.eq.f32.partialorder %v1257_v61, 8.507059e+37 }
 0x6ba   :  { %v1641_v9 = vpop.eup %1640 }
 0x6bb   :  { %v1247_v55 = vadd.f32 1.0, %v1641_v9  ;;  %v1643_v32 = vpop.eup %1642 }
 0x6bc   :  { %v1249_v17 = vmul.f32 %v1643_v32, %v1246_v57  ;;  %vm1254_vm5 = vweird.f32 %v1643_v32 }
 0x6bd   :  { %1644 = vrcp.f32 %v1247_v55  ;;  %vm1255_vm8 = vmor %vm1253_vm6, %vm1254_vm5  ;;  %v1274_v28 = vand.u32 2147483648, %v1247_v55  ;;  %vm1268_vm9 = vweird.f32 %v1247_v55  ;;  %v1272_v48 = vand.u32 2147483647, %v1247_v55 }
 0x6be   :  { %v1250_v13 = vsub.f32 1.0, %v1249_v17 }
 0x6bf   :  { %v1275_v30 = vor.u32 1.1754944e-38, %v1274_v28  ;;  %vm1273_vm1 = vcmp.eq.f32.partialorder %v1272_v48, 8.507059e+37 }
 0x6c0   :  { %v1251_v52 = vmul.f32 %v1643_v32, %v1250_v13 }
 0x6c2   :  { %v1252_v26 = vadd.f32 %v1643_v32, %v1251_v52 }
 0x6c3   :  { %v1645_v58 = vpop.eup %1644 }
 0x6c4   :  { %v1264_v18 = vmul.f32 %v1645_v58, %v1247_v55  ;;  %vm1269_vm7 = vweird.f32 %v1645_v58  ;;  %v1256_v29 = vsel %vm1255_vm8, %v1643_v32, %v1252_v26 }
 0x6c5   :  { %vm1270_vm10 = vmor %vm1268_vm9, %vm1269_vm7  ;;  %v1261_v21 = vsel %vm1258_vm0, %v1260_v2, %v1256_v29 }
 0x6c6   :  { %v1265_v19 = vsub.f32 1.0, %v1264_v18  ;;  %v1311_v35 = vsub.f32 1.0, %v1261_v21 }
 0x6c8   :  { %v1266_v39 = vmul.f32 %v1645_v58, %v1265_v19  ;;  %v1313_v42 = vmul.f32 %v1311_v35, %v2585_v22 }
 0x6ca   :  { %v1267_v46 = vadd.f32 %v1645_v58, %v1266_v39 }
 0x6cc   :  { %v1271_v49 = vsel %vm1270_vm10, %v1645_v58, %v1267_v46 }
 0x6cd   :  { %v1276_v33 = vsel %vm1273_vm1, %v1275_v30, %v1271_v49 }
 0x6ce   :  { %v1312_v41 = vsub.f32 1.0, %v1276_v33 }
 0x6d0   :  { %v1314_v45 = vmul.f32 %v1312_v41, %v2590_v56  ;;  %v1410_v56 = vpop.f32.mrf.mxu0 }
 0x6d3   :  { %v1204_v0 = vpop.f32.mrf.mxu2 }
 0x6d4   :  { %1532 = vmatmul.msk.f32.vlgmr.msra.gmra.mxu3 %vm387_vm3, %v1204_v0 }
 0x6d8   :  { %v1413_v63 = vpop.f32.mrf.mxu0 }
 0x6db   :  { %v1206_v1 = vpop.f32.mrf.mxu2 }
 0x6dc   :  { %1533 = vmatmul.msk.f32.gmra.mxu3 %vm387_vm3, %v1206_v1 }
 0x757   :  { %v1301_v47 = vpop.f32.mrf.mxu3 }
 0x758   :  { %v1307_v6 = vadd.f32 %v1301_v47, %v2337_v62 }
 0x75a   :  { %1646 = vtanh.f32 %v1307_v6 }
 0x75f   :  { %v1304_v62 = vpop.f32.mrf.mxu3 }
 0x760   :  { %v1308_v25 = vadd.f32 %v1304_v62, %v2340_v10  ;;  %v1647_v27 = vpop.eup %1646 }
 0x761   :  { %v1315_v40 = vmul.f32 %v1647_v27, %v1261_v21 }
 0x762   :  { %1648 = vtanh.f32 %v1308_v25 }
 0x763   :  { %v1317_v11 = vadd.f32 %v1315_v40, %v1313_v42 }
 0x765   :  { %v1323_v51 = vsel %vm1177_vm15, %v1317_v11, %v2572_v14  ;;  %v1577_v14 = vld [vmem:[%s2655_s18] ss:$0 sm:$0xff] }
 0x768   :  { %v1649_v10 = vpop.eup %1648 }
 0x769   :  { %v1316_v31 = vmul.f32 %v1649_v10, %v1276_v33 }
 0x76b   :  { %v1318_v50 = vadd.f32 %v1316_v31, %v1314_v45 }
 0x76d   :  { %v1324_v53 = vsel %vm1178_vm4, %v1318_v50, %v2578_v36 }
 0x76e   :  { %v1327_v34 = vpack.c.bf16 %v1324_v53, %v1323_v51 }
 0x770   :  { %1343 = vmatpush.bf16.msra.mxu1 %v1327_v34 }
 0x773   :  { %1538 = vmatmul.msk.bf16.vlgmr.msra.gmra.mxu1 %vm337_vm2, %v1548_v54 }
 0x7f0   :  { %v1345_v38 = vpop.f32.mrf.mxu1 }
 0x7f1   :  { %1539 = vmatmul.msk.f32.vlgmr.msra.gmra.mxu2 %vm387_vm3, %v1345_v38 }
 0x7f8   :  { %v1347_v22 = vpop.f32.mrf.mxu1 }
 0x7f9   :  { %1540 = vmatmul.msk.f32.gmra.mxu2 %vm387_vm3, %v1347_v22 }
 0x874   :  { %v1381_v59 = vpop.f32.mrf.mxu2 }
 0x875   :  { %v1411_v36 = vadd.f32 %v1410_v56, %v1381_v59 }
 0x877   :  { %v1420_v12 = vadd.f32 %v1577_v14, %v1411_v36 }
 0x879   :  { %v1422_v60 = vmax.f32 %v1420_v12, 0.0 }
 0x87b   :  { %1424 = vst.msk [vmem:[#allocation27] sm:$0xff] %vm387_vm3, %v1422_v60 }
 0x87c   :  { %v1384_v0 = vpop.f32.mrf.mxu2 }
 0x87d   :  { %v1414_v1 = vadd.f32 %v1413_v63, %v1384_v0 }
 0x87f   :  { %v1421_v4 = vadd.f32 %v1577_v14, %v1414_v1 }
 0x881   :  { %v1423_v7 = vmax.f32 %v1421_v4, 0.0 }
 0x883   :  { %1425 = vst.msk [vmem:[#allocation27 + $0x8] sm:$0xff] %vm387_vm3, %v1423_v7 }
 0x884   :  { %1438 = dma.vmem_to_hbm [thread:$0]  %s1431_s27, 256, %s1433_s0, [#allocation6], %s2050_s26, %s2050_s26, %s2051_s29  }
 0x885   :  { %2041 = dma.done.wait [#allocation6], 256  }
 0x886   :  { %2042 = vsyncadd [#allocation6], 4294967040 }
 0x887   :  { %1443 = vsyncpa [#allocation5], 1 }
 0x888   :  { %1444 = vsyncpa [#allocation8], 1 }
 0x889   :  { %1445 = vsyncpa [#allocation11], 1 }
 0x88a   :  { %1446 = vsyncpa [#allocation14], 1 }
 0x88b   :  { %1447 = vsyncpa [#allocation17], 1 }
 0x88c   :  { %1448 = vsyncpa [#allocation20], 1 }
 0x88d   :  { %1449 = vsyncpa [#allocation23], 1 }
 0x88e   :  { %1450 = vsyncpa [#allocation26], 1 }
 0x88f   :  { %1451 = vsyncpa [#allocation6], 1 }

</bundles_post_ra>
